<compile_context>
chip_gen: v7x
topology: tpu7x:2x2x1
jax: 0.10.0
libtpu: 0.0.40
codegen_flags: <defaults>
</compile_context>

<pallas_src>
import functools
import math

import jax
import jax.numpy as jnp
from jax import lax
from jax.experimental import pallas as pl
from jax.experimental.pallas import tpu as pltpu


def _round_up(x, m):
    return ((x + m - 1) // m) * m


def _make_conv_bn_kernel(tm, tb, W, KH, KW, IC):
    """Implicit-GEMM ConvBN kernel for static (tm, tb, W, KH, KW, IC)."""
    offsets = [kh * W + kw for kh in range(KH) for kw in range(KW)]

    def kernel(xa_ref, xb_ref, w_ref, shift_ref, out_ref, xt_ref, lhs_ref):
        # xa_ref   : (tm, IC)         bf16  main row tile of flattened NHWC input
        # xb_ref   : (tb, IC)         bf16  halo rows immediately after the tile
        # w_ref    : (KH*KW*IC, tn)   bf16  BN-scale-folded, OC-padded weights
        # shift_ref: (1, tn)          f32   BN shift (beta - mean*scale), padded
        # out_ref  : (tm, tn)         out_dtype
        # xt_ref   : (tm+tb, IC)      bf16  scratch: tile + halo stitched together
        # lhs_ref  : (tm, KH*KW*IC)   bf16  scratch: implicit-im2col LHS
        xt_ref[0:tm, :] = xa_ref[...]
        xt_ref[tm:tm + tb, :] = xb_ref[...]

        # Build the (tm, KH*KW*IC) LHS once via ref-level static slices:
        # no f32 upcast, no per-tap downcasts, no per-tap accumulator RMW.
        for idx, d in enumerate(offsets):
            lhs_ref[:, idx * IC:(idx + 1) * IC] = xt_ref[d:d + tm, :]

        # ONE MXU dot with K = KH*KW*IC (instead of KH*KW dots with K = IC).
        acc = jnp.dot(lhs_ref[...], w_ref[...],
                      preferred_element_type=jnp.float32)
        out_ref[...] = (acc + shift_ref[...]).astype(out_ref.dtype)   # fused BN

    return kernel


def conv_bn_forward(x_nchw, conv_w, gamma, beta, run_mean, run_var,
                    *, stride=1, eps=1e-3, out_dtype=jnp.float32):
    """x_nchw: (N, IC, H, W) f32.  conv_w: (OC, IC, KH, KW).  Returns NCHW."""
    N, IC, H, W = x_nchw.shape
    OC, _, KH, KW = conv_w.shape
    OH = (H - KH) // stride + 1
    OW = (W - KW) // stride + 1

    # ---- BN (inference) folded into a per-channel affine; scale goes into W --
    inv_std = lax.rsqrt(run_var.astype(jnp.float32) + eps)
    scale = gamma.astype(jnp.float32) * inv_std                      # (OC,)
    shift = beta.astype(jnp.float32) - run_mean.astype(jnp.float32) * scale

    OCp = _round_up(OC, 128)                                         # lane-dense
    w = jnp.transpose(conv_w.astype(jnp.float32), (2, 3, 1, 0))      # (KH,KW,IC,OC)
    w = (w * scale[None, None, None, :]).reshape(KH * KW * IC, OC)   # GEMM K-major
    w = jnp.pad(w, ((0, 0), (0, OCp - OC))).astype(jnp.bfloat16)
    shift_p = jnp.pad(shift, (0, OCp - OC)).reshape(1, OCp)

    # ---- row tiling: tm is a multiple of the 16-aligned halo block tb --------
    M = N * H * W
    halo = (KH - 1) * W + (KW - 1)
    tb = _round_up(max(halo, 1), 16)          # bf16 sublane-pack aligned
    row_cap = min(max(512, 4 * tb), 4096)     # amortize per-step overhead
    # Keep >= 2 row tiles whenever M allows (v7x megacore: both TCs get work).
    m_blocks = max(1, min(row_cap // tb, max(1, pl.cdiv(M, 2) // tb)))
    tm = m_blocks * tb
    num_m = pl.cdiv(M, tm)
    r = tm // tb                              # halo stride in units of tb blocks
    rows_pad = num_m * tm + tb                # covers the last tile's halo block

    # ---- OC tiling: largest 128-multiple divisor of OCp under a ~40 MiB
    #      VMEM budget -> weights fetched from HBM exactly once --------------
    out_bytes = jnp.dtype(out_dtype).itemsize
    budget = 40 * 1024 * 1024
    tn = 128
    for cand in range(OCp, 127, -128):
        if OCp % cand:
            continue
        vmem_est = (2 * ((tm + tb) * IC * 2            # input + halo blocks (x2 buf)
                         + KH * KW * IC * cand * 2     # weight block
                         + 8 * cand * 4                # shift block (padded rows)
                         + tm * cand * out_bytes)      # output block
                    + (tm + tb) * IC * 2               # xt scratch
                    + tm * KH * KW * IC * 2            # lhs scratch
                    + tm * cand * 4)                   # f32 acc value
        if vmem_est <= budget:
            tn = cand
            break
    num_n = OCp // tn

    # ---- glue: NCHW -> flattened pixel-major (N*H*W, IC) bf16, row-padded ----
    # (fuses into one copy pass under jit; accepting NHWC/bf16 inputs directly
    #  would remove it entirely.)
    x_flat = jnp.transpose(x_nchw, (0, 2, 3, 1)).reshape(M, IC).astype(jnp.bfloat16)
    x_pad = jnp.pad(x_flat, ((0, rows_pad - M), (0, 0)))

    kernel = _make_conv_bn_kernel(tm, tb, W, KH, KW, IC)

    flops = 2 * num_m * tm * (KH * KW * IC) * OCp
    bytes_accessed = int(num_n * rows_pad * IC * 2        # input, read per OC tile
                         + KH * KW * IC * OCp * 2         # weights, fetched once
                         + num_m * tm * OCp * out_bytes   # output
                         + OCp * 8)

    out_flat = pl.pallas_call(
        kernel,
        out_shape=jax.ShapeDtypeStruct((num_m * tm, OCp), out_dtype),
        grid_spec=pltpu.PrefetchScalarGridSpec(
            num_scalar_prefetch=0,
            # j (OC tiles) is the SLOW axis, i (row tiles) the fast one: the
            # weight/shift block index is constant across the inner i loop, so
            # Pallas keeps them VMEM-resident and never re-streams them.
            grid=(num_n, num_m),
            in_specs=[
                # main row tile of the input
                pl.BlockSpec((tm, IC), lambda j, i: (i, 0)),
                # halo rows right after the tile (same HBM buffer, next blocks)
                pl.BlockSpec((tb, IC), lambda j, i: ((i + 1) * r, 0)),
                # BN-folded weights, tiled over output channels
                pl.BlockSpec((KH * KW * IC, tn), lambda j, i: (0, j)),
                # BN shift, tiled over output channels
                pl.BlockSpec((1, tn), lambda j, i: (0, j)),
            ],
            out_specs=pl.BlockSpec((tm, tn), lambda j, i: (i, j)),
            scratch_shapes=[
                pltpu.VMEM((tm + tb, IC), jnp.bfloat16),          # xt scratch
                pltpu.VMEM((tm, KH * KW * IC), jnp.bfloat16),     # lhs scratch
            ],
        ),
        compiler_params=pltpu.CompilerParams(
            dimension_semantics=("parallel", "parallel"),
            vmem_limit_bytes=48 * 1024 * 1024,   # >v5e/v6e scoped default, <=v7x safe
        ),
        cost_estimate=pl.CostEstimate(
            flops=flops, transcendentals=0, bytes_accessed=bytes_accessed),
    )(x_pad, x_pad, w, shift_p)

    # ---- glue: full-resolution grid -> valid (strided) output, back to NCHW --
    conv_full = out_flat[:M].reshape(N, H, W, OCp)
    out_nhwc = conv_full[:, :(OH - 1) * stride + 1:stride,
                         :(OW - 1) * stride + 1:stride, :OC]
    # TODO(synk): for stride > 1, select valid rows before the HBM store and
    # optionally emit NHWC directly instead of this slice + transpose pass.
    return jnp.transpose(out_nhwc, (0, 3, 1, 2))


# ------------------------------------------------------------------------------
# Pure-JAX references for correctness checks.
# ------------------------------------------------------------------------------
def conv_bn_reference(x, conv_w, gamma, beta, run_mean, run_var,
                      *, stride=1, eps=1e-3):
    """Full-f32 ConvBN (inference BN), matching the PyTorch module."""
    y = lax.conv_general_dilated(
        x, conv_w, (stride, stride), "VALID",
        dimension_numbers=("NCHW", "OIHW", "NCHW"),
        precision=lax.Precision.HIGHEST)
    inv = lax.rsqrt(run_var + eps)
    scale = (gamma * inv).reshape(1, -1, 1, 1)
    shift = (beta - run_mean * gamma * inv).reshape(1, -1, 1, 1)
    return y * scale + shift


def conv_bn_reference_bf16(x, conv_w, gamma, beta, run_mean, run_var,
                           *, stride=1, eps=1e-3):
    """Reference with the same bf16 quantization of (x, scale-folded W) as the kernel."""
    inv = lax.rsqrt(run_var + eps)
    scale = gamma * inv
    shift = beta - run_mean * scale
    w_s = (conv_w * scale[:, None, None, None]).astype(jnp.bfloat16).astype(jnp.float32)
    x_b = x.astype(jnp.bfloat16).astype(jnp.float32)
    y = lax.conv_general_dilated(
        x_b, w_s, (stride, stride), "VALID",
        dimension_numbers=("NCHW", "OIHW", "NCHW"),
        precision=lax.Precision.HIGHEST)
    return y + shift.reshape(1, -1, 1, 1)


if __name__ == "__main__":
    # Small shapes consistent with ConvBN(in_channels=4, out_channels=8,
    # kernel_size=3, bias=False) applied to a (2, 4, 16, 16) input.
    N, IC, H, W = 2, 4, 16, 16
    OC, KH, KW = 8, 3, 3
    stride = 1

    key = jax.random.PRNGKey(0)
    kx, kw, kg, kb, km, kv = jax.random.split(key, 6)

    x = jax.random.normal(kx, (N, IC, H, W), dtype=jnp.float32)
    fan_in = IC * KH * KW
    bound = 1.0 / math.sqrt(fan_in)
    conv_w = jax.random.uniform(kw, (OC, IC, KH, KW), jnp.float32, -bound, bound)
    gamma = jax.random.uniform(kg, (OC,), jnp.float32, 0.5, 1.5)
    beta = jax.random.normal(kb, (OC,), jnp.float32) * 0.1
    run_mean = jax.random.normal(km, (OC,), jnp.float32) * 0.1
    run_var = jax.random.uniform(kv, (OC,), jnp.float32, 0.5, 1.5)

    fwd = jax.jit(functools.partial(conv_bn_forward, stride=stride, eps=1e-3))
    out = jax.block_until_ready(fwd(x, conv_w, gamma, beta, run_mean, run_var))

    OH = (H - KH) // stride + 1
    OW = (W - KW) // stride + 1
    assert out.shape == (N, OC, OH, OW), out.shape

    # Tight check vs a reference using the identical bf16 quantization (isolates
    # kernel correctness from the intentional bf16 MXU-input rounding).
    ref_q = conv_bn_reference_bf16(x, conv_w, gamma, beta, run_mean, run_var,
                                   stride=stride, eps=1e-3)
    assert jnp.allclose(out, ref_q, rtol=1e-3, atol=1e-3), \
        f"mismatch vs bf16-quantized reference: {jnp.max(jnp.abs(out - ref_q))}"

    # Sanity check vs the full-f32 ConvBN reference (bf16 inputs => ~1e-2 abs).
    ref = conv_bn_reference(x, conv_w, gamma, beta, run_mean, run_var,
                            stride=stride, eps=1e-3)
    assert jnp.allclose(out, ref, rtol=5e-2, atol=5e-2), \
        f"mismatch vs f32 reference: {jnp.max(jnp.abs(out - ref))}"

    print("KERNEL_OK")
</pallas_src>

<mosaic_0001>
module attributes {stable_mosaic.version = 11 : i64} {
  func.func @kernel(%arg0: i32, %arg1: i32, %arg2: memref<240x4xbf16, #tpu.memory_space<vmem>>, %arg3: memref<48x4xbf16, #tpu.memory_space<vmem>>, %arg4: memref<36x128xbf16, #tpu.memory_space<vmem>>, %arg5: memref<1x128xf32, #tpu.memory_space<vmem>>, %arg6: memref<240x128xf32, #tpu.memory_space<vmem>>, %arg7: memref<288x4xbf16, #tpu.memory_space<vmem>>, %arg8: memref<240x36xbf16, #tpu.memory_space<vmem>>) attributes {dimension_semantics = [#tpu.dimension_semantics<parallel>, #tpu.dimension_semantics<parallel>], iteration_bounds = array<i64: 1, 3>, scalar_prefetch = 0 : i64, scratch_operands = 2 : i64, tpu.core_type = #tpu.core_type<tc>, window_params = [{transform_indices = @transform_0, window_bounds = array<i64: 240, 4>}, {transform_indices = @transform_1, window_bounds = array<i64: 48, 4>}, {transform_indices = @transform_2, window_bounds = array<i64: 36, 128>}, {transform_indices = @transform_3, window_bounds = array<i64: 1, 128>}, {transform_indices = @transform_4, window_bounds = array<i64: 240, 128>}]} {
    %c0 = arith.constant 0 : index
    %c0_0 = arith.constant 0 : index
    %0 = vector.load %arg2[%c0, %c0_0] : memref<240x4xbf16, #tpu.memory_space<vmem>>, vector<240x4xbf16>
    %c0_1 = arith.constant 0 : index
    %c0_2 = arith.constant 0 : index
    %1 = vector.load %arg7[%c0_1, %c0_2] : memref<288x4xbf16, #tpu.memory_space<vmem>>, vector<240x4xbf16>
    tpu.vector_store %arg7[%c0_1, %c0_2], %0 {strides = array<i32>} : memref<288x4xbf16, #tpu.memory_space<vmem>>, vector<240x4xbf16>,
    %c0_3 = arith.constant 0 : index
    %c0_4 = arith.constant 0 : index
    %2 = vector.load %arg3[%c0_3, %c0_4] : memref<48x4xbf16, #tpu.memory_space<vmem>>, vector<48x4xbf16>
    %c240 = arith.constant 240 : index
    %c0_5 = arith.constant 0 : index
    %3 = vector.load %arg7[%c240, %c0_5] : memref<288x4xbf16, #tpu.memory_space<vmem>>, vector<48x4xbf16>
    tpu.vector_store %arg7[%c240, %c0_5], %2 {strides = array<i32>} : memref<288x4xbf16, #tpu.memory_space<vmem>>, vector<48x4xbf16>,
    %c0_6 = arith.constant 0 : index
    %c0_7 = arith.constant 0 : index
    %4 = vector.load %arg7[%c0_6, %c0_7] : memref<288x4xbf16, #tpu.memory_space<vmem>>, vector<240x4xbf16>
    %c0_8 = arith.constant 0 : index
    %c0_9 = arith.constant 0 : index
    %5 = vector.load %arg8[%c0_8, %c0_9] : memref<240x36xbf16, #tpu.memory_space<vmem>>, vector<240x4xbf16>
    tpu.vector_store %arg8[%c0_8, %c0_9], %4 {strides = array<i32>} : memref<240x36xbf16, #tpu.memory_space<vmem>>, vector<240x4xbf16>,
    %c1 = arith.constant 1 : index
    %c0_10 = arith.constant 0 : index
    %6 = vector.load %arg7[%c1, %c0_10] : memref<288x4xbf16, #tpu.memory_space<vmem>>, vector<240x4xbf16>
    %c0_11 = arith.constant 0 : index
    %c4 = arith.constant 4 : index
    %7 = vector.load %arg8[%c0_11, %c4] : memref<240x36xbf16, #tpu.memory_space<vmem>>, vector<240x4xbf16>
    tpu.vector_store %arg8[%c0_11, %c4], %6 {strides = array<i32>} : memref<240x36xbf16, #tpu.memory_space<vmem>>, vector<240x4xbf16>,
    %c2 = arith.constant 2 : index
    %c0_12 = arith.constant 0 : index
    %8 = vector.load %arg7[%c2, %c0_12] : memref<288x4xbf16, #tpu.memory_space<vmem>>, vector<240x4xbf16>
    %c0_13 = arith.constant 0 : index
    %c8 = arith.constant 8 : index
    %9 = vector.load %arg8[%c0_13, %c8] : memref<240x36xbf16, #tpu.memory_space<vmem>>, vector<240x4xbf16>
    tpu.vector_store %arg8[%c0_13, %c8], %8 {strides = array<i32>} : memref<240x36xbf16, #tpu.memory_space<vmem>>, vector<240x4xbf16>,
    %c16 = arith.constant 16 : index
    %c0_14 = arith.constant 0 : index
    %10 = vector.load %arg7[%c16, %c0_14] : memref<288x4xbf16, #tpu.memory_space<vmem>>, vector<240x4xbf16>
    %c0_15 = arith.constant 0 : index
    %c12 = arith.constant 12 : index
    %11 = vector.load %arg8[%c0_15, %c12] : memref<240x36xbf16, #tpu.memory_space<vmem>>, vector<240x4xbf16>
    tpu.vector_store %arg8[%c0_15, %c12], %10 {strides = array<i32>} : memref<240x36xbf16, #tpu.memory_space<vmem>>, vector<240x4xbf16>,
    %c17 = arith.constant 17 : index
    %c0_16 = arith.constant 0 : index
    %12 = vector.load %arg7[%c17, %c0_16] : memref<288x4xbf16, #tpu.memory_space<vmem>>, vector<240x4xbf16>
    %c0_17 = arith.constant 0 : index
    %c16_18 = arith.constant 16 : index
    %13 = vector.load %arg8[%c0_17, %c16_18] : memref<240x36xbf16, #tpu.memory_space<vmem>>, vector<240x4xbf16>
    tpu.vector_store %arg8[%c0_17, %c16_18], %12 {strides = array<i32>} : memref<240x36xbf16, #tpu.memory_space<vmem>>, vector<240x4xbf16>,
    %c18 = arith.constant 18 : index
    %c0_19 = arith.constant 0 : index
    %14 = vector.load %arg7[%c18, %c0_19] : memref<288x4xbf16, #tpu.memory_space<vmem>>, vector<240x4xbf16>
    %c0_20 = arith.constant 0 : index
    %c20 = arith.constant 20 : index
    %15 = vector.load %arg8[%c0_20, %c20] : memref<240x36xbf16, #tpu.memory_space<vmem>>, vector<240x4xbf16>
    tpu.vector_store %arg8[%c0_20, %c20], %14 {strides = array<i32>} : memref<240x36xbf16, #tpu.memory_space<vmem>>, vector<240x4xbf16>,
    %c32 = arith.constant 32 : index
    %c0_21 = arith.constant 0 : index
    %16 = vector.load %arg7[%c32, %c0_21] : memref<288x4xbf16, #tpu.memory_space<vmem>>, vector<240x4xbf16>
    %c0_22 = arith.constant 0 : index
    %c24 = arith.constant 24 : index
    %17 = vector.load %arg8[%c0_22, %c24] : memref<240x36xbf16, #tpu.memory_space<vmem>>, vector<240x4xbf16>
    tpu.vector_store %arg8[%c0_22, %c24], %16 {strides = array<i32>} : memref<240x36xbf16, #tpu.memory_space<vmem>>, vector<240x4xbf16>,
    %c33 = arith.constant 33 : index
    %c0_23 = arith.constant 0 : index
    %18 = vector.load %arg7[%c33, %c0_23] : memref<288x4xbf16, #tpu.memory_space<vmem>>, vector<240x4xbf16>
    %c0_24 = arith.constant 0 : index
    %c28 = arith.constant 28 : index
    %19 = vector.load %arg8[%c0_24, %c28] : memref<240x36xbf16, #tpu.memory_space<vmem>>, vector<240x4xbf16>
    tpu.vector_store %arg8[%c0_24, %c28], %18 {strides = array<i32>} : memref<240x36xbf16, #tpu.memory_space<vmem>>, vector<240x4xbf16>,
    %c34 = arith.constant 34 : index
    %c0_25 = arith.constant 0 : index
    %20 = vector.load %arg7[%c34, %c0_25] : memref<288x4xbf16, #tpu.memory_space<vmem>>, vector<240x4xbf16>
    %c0_26 = arith.constant 0 : index
    %c32_27 = arith.constant 32 : index
    %21 = vector.load %arg8[%c0_26, %c32_27] : memref<240x36xbf16, #tpu.memory_space<vmem>>, vector<240x4xbf16>
    tpu.vector_store %arg8[%c0_26, %c32_27], %20 {strides = array<i32>} : memref<240x36xbf16, #tpu.memory_space<vmem>>, vector<240x4xbf16>,
    %c0_28 = arith.constant 0 : index
    %c0_29 = arith.constant 0 : index
    %22 = vector.load %arg8[%c0_28, %c0_29] : memref<240x36xbf16, #tpu.memory_space<vmem>>, vector<240x36xbf16>
    %c0_30 = arith.constant 0 : index
    %c0_31 = arith.constant 0 : index
    %23 = vector.load %arg4[%c0_30, %c0_31] : memref<36x128xbf16, #tpu.memory_space<vmem>>, vector<36x128xbf16>
    %cst = arith.constant dense<0.000000e+00> : vector<240x128xf32>
    %24 = tpu.matmul %22, %23, %cst {dimension_numbers = #tpu.dot_dimension_numbers<[1], [0], [0], [1], [0, 0, 1, 1], [], []>} : vector<240x36xbf16>, vector<36x128xbf16>, vector<240x128xf32> -> vector<240x128xf32>
    %c0_32 = arith.constant 0 : index
    %c0_33 = arith.constant 0 : index
    %25 = vector.load %arg5[%c0_32, %c0_33] : memref<1x128xf32, #tpu.memory_space<vmem>>, vector<1x128xf32>
    %26 = vector.broadcast %25 : vector<1x128xf32> to vector<240x128xf32>
    %27 = arith.addf %24, %26 : vector<240x128xf32>
    %c0_34 = arith.constant 0 : index
    %c0_35 = arith.constant 0 : index
    %28 = vector.load %arg6[%c0_34, %c0_35] : memref<240x128xf32, #tpu.memory_space<vmem>>, vector<240x128xf32>
    tpu.vector_store %arg6[%c0_34, %c0_35], %27 {strides = array<i32>} : memref<240x128xf32, #tpu.memory_space<vmem>>, vector<240x128xf32>,
    return
  }
  func.func @transform_0(%arg0: i32, %arg1: i32) -> (i32, i32) {
    %c0_i32 = arith.constant 0 : i32
    %c0_i32_0 = arith.constant 0 : i32
    return %arg1, %c0_i32 : i32, i32
  }
  func.func @transform_1(%arg0: i32, %arg1: i32) -> (i32, i32) {
    %c1_i32 = arith.constant 1 : i32
    %0 = arith.addi %arg1, %c1_i32 : i32
    %c5_i32 = arith.constant 5 : i32
    %1 = arith.muli %0, %c5_i32 : i32
    %c0_i32 = arith.constant 0 : i32
    %c0_i32_0 = arith.constant 0 : i32
    return %1, %c0_i32 : i32, i32
  }
  func.func @transform_2(%arg0: i32, %arg1: i32) -> (i32, i32) {
    %c0_i32 = arith.constant 0 : i32
    %c0_i32_0 = arith.constant 0 : i32
    return %c0_i32, %arg0 : i32, i32
  }
  func.func @transform_3(%arg0: i32, %arg1: i32) -> (i32, i32) {
    %c0_i32 = arith.constant 0 : i32
    %c0_i32_0 = arith.constant 0 : i32
    return %c0_i32, %arg0 : i32, i32
  }
  func.func @transform_4(%arg0: i32, %arg1: i32) -> (i32, i32) {
    %c0_i32 = arith.constant 0 : i32
    return %arg1, %arg0 : i32, i32
  }
}

</mosaic_0001>

<bundles_post_ra>
// kernel: conv_bn_forward.1
= control target key start
LH: loop header
LB: loop body
LE: loop exit
PB: predicated region body
PF: predicated region fallthrough
CT: control target
= control target key end

     0   :  { %s2304_s15 = smov 0   ;;  %s2306_s16 = smov 0   ;;  %s3103_s0 = inlined_call_operand.vmem [shape: bf16[768,4], index: 0, kind: input, shape index: {}, may-alias: {0,1}]   ;;  %s3104_s1 = inlined_call_operand.vmem [shape: bf16[768,4], index: 1, kind: input, shape index: {}, may-alias: {0,1}]   ;;  %s3105_s2 = inlined_call_operand.vmem [shape: bf16[36,128], index: 2, kind: input, shape index: {}]   ;;  %s3106_s3 = inlined_call_operand.vmem [shape: f32[1,128], index: 3, kind: input, shape index: {}]   ;;  %s3107_s4 = inlined_call_operand.vmem [shape: f32[720,128], index: 4, kind: output, shape index: {}]  }
   0x1   :  { %s2308_s17 = smov 0  }
   0x2 LB: > { %s23_s18 = sadd.s32 1, %s2263_s16  ;;  %p2056_p0 = scmp.ge.s32.totalorder %s2267_s17, 1  ;;  %s2267_s17 = sphi %s2308_s17, %s14_s17   ;;  %s2263_s16 = sphi %s2306_s16, %s3109_s16   ;;  %s2259_s15 = sphi %s2304_s15, %s3108_s15  }
   0x3   : > { %p24_p1 = scmp.ge.s32.totalorder %s23_s18, 3  ;;  %p221_p2 = scmp.lt.s32.totalorder %s2267_s17, 4 }
   0x5   : > { %s3111_s18 = smov (%p24_p1, %s23_s18), 0  ;;  %p222_p3 = pnand %p2056_p0, %p221_p2 }
   0x6   : > { %s2325_s19 = smul.u32 (!%p222_p3), 30, %s2259_s15  ;;  %vm429_vm0 = vcmask (!%p222_p3), 31744   ;;  %s2269_s25 = smov (!%p222_p3), 12   ;;  %vm736_vm1 = vcmask (!%p222_p3), 1046528   ;;  %vm518_vm2 = vsmask.f32 (!%p222_p3), 7424 }
   0x7   : > { %225 = sbr.rel (%p222_p3) target bundleno = 603 (0x25b), region = 36  ;;  %s2270_s26 = smov (!%p222_p3), 24   ;;  %vm2278_vm3 = vmmov (!%p222_p3), 0   ;;  %vm1749_vm4 = vcmask (!%p222_p3), 1041408   ;;  %vm688_vm5 = vcmask (!%p222_p3), 64544   ;;  %vm813_vm6 = vcmask (!%p222_p3), 97344  }
   0x8   : > { %p273_p4 = scmp.lt.s32.totalorder (!%p222_p3), %s2325_s19, 95  ;;  %s2271_s27 = smov (!%p222_p3), 8   ;;  %vm904_vm7 = vcmask (!%p222_p3), 130144   ;;  %vm1105_vm8 = vcmask (!%p222_p3), 162944   ;;  %vm1229_vm9 = vcmask (!%p222_p3), 195744   ;;  %vm1320_vm10 = vcmask (!%p222_p3), 228544  }
   0x9   : > { %s2272_s28 = smov (!%p222_p3), 20   ;;  %s2273_s29 = smov (!%p222_p3), 32   ;;  %vm1521_vm11 = vcmask (!%p222_p3), 261344   ;;  %vm1645_vm12 = vcmask (!%p222_p3), 294144   ;;  %vm1703_vm13 = vcmask (!%p222_p3), 293888  }
   0xa   : > { %s2274_s30 = smov (!%p222_p3), 4   ;;  %s282_s5 = sadd.s32 (!%p222_p3), 1, %s2259_s15 }
   0xb   : > { %s2058_s6 = smul.u32 (!%p222_p3), 30, %s282_s5  ;;  %s2275_s7 = smov (!%p222_p3), 16  }
   0xc   : > { %s2276_s8 = smov (!%p222_p3), 28   ;;  %p300_p6 = scmp.lt.s32.totalorder (!%p222_p3), %s2325_s19, 89 }
   0xd   : > { %p285_p5 = scmp.lt.s32.totalorder (!%p222_p3), %s2058_s6, 95 }
   0xe   : > { %s274_s20 = scalar_select %p273_p4, %s2325_s19, 95 }
   0xf   : > { %s3113_s6 = smov (!%p285_p5, %s2058_s6), 95  ;;  %s3115_s19 = smov (!%p300_p6, %s2325_s19), 89 }
  0x10   : > { %s2057_s21 = sshll.u32 %s274_s20, 2  ;;  %s2059_s11 = sshll.u32 %s3113_s6, 2 }
  0x11   : > { %s2332_s24 = scalar_lea.vmem %s3103_s0, %s2057_s21  ;;  %s2458_s14 = scalar_lea.vmem %s3104_s1, %s2059_s11 }
  0x12   : > { %v2224_v0 = vld [vmem:[%s2332_s24 + $0x10] sm:$0xff]   ;;  %v2225_v1 = vld [vmem:[%s2332_s24 + $0x8] sm:$0xff]   ;;  %v2226_v2 = vld [vmem:[%s2332_s24] sm:$0xff]   ;;  %s2060_s23 = sshll.u32 %s3115_s19, 3 }
  0x13   : > { %432 = vst.msk [vmem:[#allocation2 + $0x10] sm:$0xff] %vm429_vm0, %v2224_v0  ;;  %431 = vst.msk [vmem:[#allocation2 + $0x8] sm:$0xff] %vm429_vm0, %v2225_v1  ;;  %v2227_v3 = vld [vmem:[%s2332_s24 + $0x48] sm:$0xff]   ;;  %v2228_v4 = vld [vmem:[%s2332_s24 + $0x18] sm:$0xff]  }
  0x14   : > { %430 = vst.msk [vmem:[#allocation2] sm:$0xff] %vm429_vm0, %v2226_v2  ;;  %439 = vst.msk [vmem:[#allocation2 + $0x48] sm:$0xff] %vm429_vm0, %v2227_v3  ;;  %v2229_v5 = vld [vmem:[%s2332_s24 + $0x40] sm:$0xff]   ;;  %v2230_v6 = vld [vmem:[%s2332_s24 + $0x50] sm:$0xff]  }
  0x15   : > { %433 = vst.msk [vmem:[#allocation2 + $0x18] sm:$0xff] %vm429_vm0, %v2228_v4  ;;  %438 = vst.msk [vmem:[#allocation2 + $0x40] sm:$0xff] %vm429_vm0, %v2229_v5  ;;  %v2231_v7 = vld [vmem:[%s2332_s24 + $0x58] sm:$0xff]   ;;  %v2232_v8 = vld [vmem:[%s2332_s24 + $0x20] sm:$0xff]  }
  0x16   : > { %440 = vst.msk [vmem:[#allocation2 + $0x50] sm:$0xff] %vm429_vm0, %v2230_v6  ;;  %441 = vst.msk [vmem:[#allocation2 + $0x58] sm:$0xff] %vm429_vm0, %v2231_v7  ;;  %v2233_v20 = vld [vmem:[%s2332_s24 + $0x60] sm:$0xff]   ;;  %v2234_v22 = vld [vmem:[%s2332_s24 + $0x28] sm:$0xff]  }
  0x17   : > { %434 = vst.msk [vmem:[#allocation2 + $0x20] sm:$0xff] %vm429_vm0, %v2232_v8  ;;  %442 = vst.msk [vmem:[#allocation2 + $0x60] sm:$0xff] %vm429_vm0, %v2233_v20  ;;  %v2235_v33 = vld [vmem:[%s2332_s24 + $0x68] sm:$0xff]   ;;  %v2236_v38 = vld [vmem:[%s2332_s24 + $0x30] sm:$0xff]   ;;  %v2277_v8 = vmov 0.0  }
  0x18   : > { %435 = vst.msk [vmem:[#allocation2 + $0x28] sm:$0xff] %vm429_vm0, %v2234_v22  ;;  %443 = vst.msk [vmem:[#allocation2 + $0x68] sm:$0xff] %vm429_vm0, %v2235_v33  ;;  %v2238_v46 = vld [vmem:[%s2332_s24 + $0x70] sm:$0xff]   ;;  %v2239_v47 = vld [vmem:[%s2332_s24 + $0x38] sm:$0xff]   ;;  %2118 = vmatprep.subr.bf16.mxu0 %v2277_v8  ;;  %2184 = vmatprep.subr.bf16.mxu1 %v2277_v8 }
  0x19   : > { %436 = vst.msk [vmem:[#allocation2 + $0x30] sm:$0xff] %vm429_vm0, %v2236_v38  ;;  %444 = vst.msk [vmem:[#allocation2 + $0x70] sm:$0xff] %vm429_vm0, %v2238_v46  ;;  %v2237_v3 = vld [vmem:[%s3105_s2] sm:$0xff]   ;;  %2124 = vmatprep.mubr.msk.bf16.mxu0 %vm2278_vm3, %v2277_v8  ;;  %2156 = vmatprep.mubr.msk.bf16.mxu1 %vm2278_vm3, %v2277_v8 }
  0x1a   : > { %v2350_v9 = vld [vmem:[#allocation2 + $0x10] sm:$0xff]  ;;  %v829_v10 = vld [vmem:[#allocation2 + $0x8] sm:$0xff]  ;;  %437 = vst.msk [vmem:[#allocation2 + $0x38] sm:$0xff] %vm429_vm0, %v2239_v47  ;;  %2119 = vmatpush3.bf16.msra.mxu0 %v2237_v3  ;;  %2187 = vmatpush3.bf16.msra.mxu1 %v2237_v3 }
  0x1b   : > { %861 = vrot.lane.b32.xlu0 %v2350_v9, %s2269_s25  ;;  %v1121_v11 = vld [vmem:[#allocation2 + $0x8] sm:$0xfe]  ;;  %859 = vrot.lane.b32.xlu1 %v829_v10, %s2269_s25  ;;  %v704_v12 = vld [vmem:[#allocation2] sm:$0xfe]  ;;  %v738_v13 = vrot.slane %v829_v10, 1  ;;  %488 = vst.msk [vmem:[#allocation3 + $0x8] sm:$0xff] %vm429_vm0, %v829_v10 }
  0x1c   : > { %v1537_v14 = vld [vmem:[#allocation2 + $0x10] sm:$0xfe]  ;;  %v502_v15 = vld [vmem:[#allocation2] sm:$0xff]  ;;  %v737_v16 = vrot.slane %v704_v12, 1  ;;  %v1153_v17 = vrot.slane %v1121_v11, 1  ;;  %v2359_v18 = vrot.slane %v2350_v9, 1  ;;  %2120 = vmatprep.subr.bf16.mxu0 %v2277_v8  ;;  %2185 = vmatprep.subr.bf16.mxu1 %v2277_v8 }
  0x1d   : > { %v522_v19 = vshll.u32 %v502_v15, 16  ;;  %487 = vst.msk [vmem:[#allocation3] sm:$0xff] %vm429_vm0, %v502_v15  ;;  %v2363_v21 = vld [vmem:[#allocation2 + $0x18] sm:$0xff]  ;;  %v2367_v24 = vld [vmem:[#allocation2 + $0x40] sm:$0xff]  ;;  %v527_v25 = vshll.u32 %v829_v10, 16  ;;  %v944_v26 = vshll.u32 %v2350_v9, 16 }
  0x1e   : > { %v739_v23 = vsel %vm736_vm1, %v737_v16, %v738_v13  ;;  %v2374_v27 = vld [vmem:[#allocation2 + $0x48] sm:$0xff]  ;;  %v1569_v28 = vrot.slane %v1537_v14, 1  ;;  %495 = vst.msk [vmem:[#allocation3 + $0x40] sm:$0xff] %vm429_vm0, %v2367_v24  ;;  %v1155_v29 = vsel %vm736_vm1, %v1153_v17, %v2359_v18  ;;  %v2382_v30 = vrot.slane %v2363_v21, 1  ;;  %v2419_v56 = vld [vmem:[#allocation2 + $0x50] sm:$0xff]  ;;  %v2451_v4 = vld [vmem:[#allocation2 + $0x58] sm:$0xff] }
  0x1f   : > { %1275 = vrot.lane.b32.xlu1 %v2350_v9, %s2270_s26  ;;  %768 = vrot.lane.b32.xlu0 %v739_v23, %s2271_s27  ;;  %v520_v31 = vshrl.u32 %v502_v15, 16  ;;  %v524_v32 = vrot.slane %v522_v19, 1  ;;  %v937_v34 = vshrl.u32 %v829_v10, 16  ;;  %v2386_v35 = vrot.slane %v2374_v27, 1  ;;  %v2453_v5 = vld [vmem:[#allocation2 + $0x20] sm:$0xff]  ;;  %v2240_v10 = vld [vmem:[%s3105_s2 + $0x8] sm:$0xff]  }
  0x20   : > { %v529_v36 = vrot.slane %v527_v25, 1  ;;  %v946_v37 = vrot.slane %v944_v26, 1  ;;  %v741_v39 = vsel %vm736_vm1, %v738_v13, %v2359_v18  ;;  %v1353_v40 = vshrl.u32 %v2350_v9, 16  ;;  %v2241_v9 = vld [vmem:[%s3105_s2 + $0x10] ss:$0 sps:$4 sm:$0x33]   ;;  %2121 = vmatpush3.bf16.msra.mxu0 %v2240_v10  ;;  %2188 = vmatpush3.bf16.msra.mxu1 %v2240_v10 }
  0x21   : > { %v1360_v41 = vshll.u32 %v2363_v21, 16  ;;  %v1571_v42 = vsel %vm736_vm1, %v1569_v28, %v2382_v30  ;;  %v752_v43 = vrot.slane %v2367_v24, 1  ;;  %v525_v44 = vor.u32 %v524_v32, %v520_v31  ;;  %v2434_v63 = vld [vmem:[#allocation2 + $0x38] sm:$0xff]  ;;  %v2242_v11 = vld [vmem:[%s2458_s14] sm:$0xff]   ;;  %2122 = vmatprep.subr.bf16.mxu0 %v2277_v8  ;;  %2186 = vmatprep.subr.bf16.mxu1 %v2277_v8  ;;  %v2498_v19 = vld [vmem:[#allocation2 + $0x48] sm:$0xff] }
  0x22   : > { %v583_v45 = vshll.u32 %v2367_v24, 16  ;;  %v942_v48 = vor.u32 %v937_v34, %v529_v36  ;;  %v1358_v49 = vor.u32 %v1353_v40, %v946_v37  ;;  %v587_v51 = vshrl.u32 %v2367_v24, 16  ;;  %494 = vst.msk [vmem:[#allocation3 + $0x38] sm:$0xff] %vm429_vm0, %v2434_v63  ;;  %469 = vst.msk [vmem:[#allocation2 + $0x78] sm:$0xff] %vm429_vm0, %v2242_v11  ;;  %v474_v26 = vld [vmem:[#allocation2 + $0x10] sm:$0xff]  ;;  %v2531_v34 = vld [vmem:[#allocation2 + $0x60] sm:$0xff] }
  0x23   : > { %875 = vrot.lane.b32.xlu1 %v2374_v27, %s2269_s25  ;;  %1184 = vrot.lane.b32.xlu0 %v1155_v29, %s2272_s28  ;;  %v2408_v50 = vrot.slane %v1360_v41, 1  ;;  %v755_v52 = vsel %vm736_vm1, %v752_v43, %v2386_v35  ;;  %v530_v53 = vsel %vm518_vm2, %v525_v44, %v529_v36  ;;  %v591_v55 = vshll.u32 %v2374_v27, 16  ;;  %496 = vst.msk [vmem:[#allocation3 + $0x48] sm:$0xff] %vm429_vm0, %v2498_v19  ;;  %v2533_v36 = vld [vmem:[#allocation2 + $0x28] sm:$0xff]  ;;  %v475_v46 = vld [vmem:[#allocation2 + $0x18] sm:$0xff] }
  0x24   : > { %v2416_v54 = vrot.slane %v583_v45, 1  ;;  %v947_v57 = vsel %vm518_vm2, %v942_v48, %v946_v37  ;;  %v1004_v61 = vshrl.u32 %v2374_v27, 16  ;;  %v1008_v62 = vshll.u32 %v2419_v56, 16  ;;  %489 = vst.msk [vmem:[#allocation3 + $0x10] sm:$0xff] %vm429_vm0, %v474_v26  ;;  %490 = vst.msk [vmem:[#allocation3 + $0x18] sm:$0xff] %vm429_vm0, %v475_v46 }
  0x25   : > { %v2426_v58 = vsel %vm518_vm2, %v1358_v49, %v2408_v50  ;;  %v2430_v60 = vrot.slane %v591_v55, 1  ;;  %v2463_v7 = vrot.slane %v2419_v56, 1  ;;  %v1157_v12 = vsel %vm736_vm1, %v2359_v18, %v2382_v30  ;;  %v2569_v55 = vld [vmem:[#allocation2 + $0x68] sm:$0xff] }
  0x26   : > { %v589_v59 = vor.u32 %v587_v51, %v2416_v54  ;;  %v2444_v2 = vrot.slane %v1008_v62, 1  ;;  %v1420_v13 = vshrl.u32 %v2419_v56, 16  ;;  %v1424_v15 = vshll.u32 %v2451_v4, 16  ;;  %v483_v62 = vld [vmem:[#allocation2 + $0x58] sm:$0xff] }
  0x27   : > { %1600 = vrot.lane.b32.xlu1 %v1571_v42, %s2273_s29  ;;  %770 = vrot.lane.b32.xlu0 %v741_v39, %s2271_s27  ;;  %v1006_v1 = vor.u32 %v1004_v61, %v2430_v60  ;;  %v1171_v14 = vsel %vm736_vm1, %v2386_v35, %v2463_v7  ;;  %v1364_v16 = vshrl.u32 %v2363_v21, 16  ;;  %v1368_v17 = vshll.u32 %v2453_v5, 16  ;;  %498 = vst.msk [vmem:[#allocation3 + $0x58] sm:$0xff] %vm429_vm0, %v483_v62 }
  0x28   : > { %v594_v0 = vsel %vm518_vm2, %v589_v59, %v2430_v60  ;;  %v1751_v18 = vsel %vm1749_vm4, %v2241_v9, 0  ;;  %v1422_v20 = vor.u32 %v1420_v13, %v2444_v2  ;;  %v1426_v22 = vrot.slane %v1424_v15, 1 }
  0x29   : > { %v1011_v6 = vsel %vm518_vm2, %v1006_v1, %v2444_v2  ;;  %v1366_v23 = vor.u32 %v1364_v16, %v2408_v50  ;;  %v1370_v25 = vrot.slane %v1368_v17, 1  ;;  %2123 = vmatpush3.bf16.msra.mxu0 %v1751_v18  ;;  %2189 = vmatpush3.bf16.msra.mxu1 %v1751_v18  ;;  %v1586_v29 = vrot.slane %v2451_v4, 1  ;;  %v2718_v62 = vld [vmem:[#allocation2 + $0x78] sm:$0xff] }
  0x2a   : > { %v1427_v27 = vsel %vm518_vm2, %v1422_v20, %v1426_v22  ;;  %v1572_v31 = vrot.slane %v2453_v5, 1  ;;  %v1428_v37 = vshrl.u32 %v2451_v4, 16  ;;  %v1432_v38 = vshll.u32 %v2531_v34, 16 }
  0x2b   : > { %784 = vrot.lane.b32.xlu1 %v755_v52, %s2271_s27  ;;  %643 = vrot.lane.b32.xlu0 %v530_v53, %s2274_s30  ;;  %v1371_v28 = vsel %vm518_vm2, %v1366_v23, %v1370_v25  ;;  %v1587_v32 = vsel %vm736_vm1, %v2463_v7, %v1586_v29  ;;  %v1372_v39 = vshrl.u32 %v2453_v5, 16  ;;  %v1376_v40 = vshll.u32 %v2533_v36, 16  ;;  %v2244_v53 = vld [vmem:[%s2458_s14 + $0x10] sm:$0xff]  }
  0x2c   : > { %v1573_v33 = vsel %vm736_vm1, %v2382_v30, %v1572_v31  ;;  %v2243_v30 = vld [vmem:[%s2458_s14 + $0x8] sm:$0xff]   ;;  %v1430_v41 = vor.u32 %v1428_v37, %v1426_v22  ;;  %v1434_v42 = vrot.slane %v1432_v38, 1  ;;  %v1588_v49 = vrot.slane %v2531_v34, 1  ;;  %471 = vst.msk [vmem:[#allocation2 + $0x88] sm:$0xff] %vm429_vm0, %v2244_v53  ;;  %v2624_v22 = vld [vmem:[#allocation2 + $0x70] sm:$0xff] }
  0x2d   : > { %470 = vst.msk [vmem:[#allocation2 + $0x80] sm:$0xff] %vm429_vm0, %v2243_v30  ;;  %v1374_v44 = vor.u32 %v1372_v39, %v1370_v25  ;;  %v1378_v45 = vrot.slane %v1376_v40, 1  ;;  %v1574_v50 = vrot.slane %v2533_v36, 1  ;;  %v1380_v59 = vshrl.u32 %v2533_v36, 16 }
  0x2e   : > { %v1435_v47 = vsel %vm518_vm2, %v1430_v41, %v1434_v42  ;;  %v1589_v51 = vsel %vm736_vm1, %v1586_v29, %v1588_v49  ;;  %v1590_v10 = vrot.slane %v2569_v55, 1  ;;  %v1444_v23 = vshrl.u32 %v2569_v55, 16 }
  0x2f   : > { %1060 = vrot.lane.b32.xlu1 %v947_v57, %s2275_s7  ;;  %1476 = vrot.lane.b32.xlu0 %v2426_v58, %s2276_s8  ;;  %v1379_v48 = vsel %vm518_vm2, %v1374_v44, %v1378_v45  ;;  %v1575_v52 = vsel %vm736_vm1, %v1572_v31, %v1574_v50  ;;  %v1382_v3 = vor.u32 %v1380_v59, %v1378_v45  ;;  %v1448_v25 = vshll.u32 %v2624_v22, 16  ;;  %v484_v31 = vld [vmem:[#allocation2 + $0x60] sm:$0xff] }
  0x30   : > { %499 = vst.msk [vmem:[#allocation3 + $0x60] sm:$0xff] %vm429_vm0, %v484_v31  ;;  %v2663_v41 = vrot.slane %v2434_v63, 1 }
  0x33   : > { %659 = vrot.lane.b32.xlu1 %v594_v0, %s2274_s30  ;;  %645 = vrot.lane.b32.xlu0 %v947_v57, %s2274_s30  ;;  %v1436_v57 = vshrl.u32 %v2531_v34, 16 }
  0x35   : > { %v1438_v0 = vor.u32 %v1436_v57, %v1434_v42 }
  0x37   : > { %1076 = vrot.lane.b32.xlu1 %v1011_v6, %s2275_s7  ;;  %1062 = vrot.lane.b32.xlu0 %v2426_v58, %s2275_s7 }
  0x3b   : > { %1200 = vrot.lane.b32.xlu1 %v1171_v14, %s2272_s28  ;;  %1186 = vrot.lane.b32.xlu0 %v1157_v12, %s2272_s28 }
  0x3f   : > { %1291 = vrot.lane.b32.xlu1 %v2419_v56, %s2270_s26  ;;  %1277 = vrot.lane.b32.xlu0 %v2363_v21, %s2270_s26 }
  0x43   : > { %1492 = vrot.lane.b32.xlu1 %v1427_v27, %s2276_s8  ;;  %1478 = vrot.lane.b32.xlu0 %v1371_v28, %s2276_s8 }
  0x47   : > { %1616 = vrot.lane.b32.xlu1 %v1587_v32, %s2273_s29  ;;  %1602 = vrot.lane.b32.xlu0 %v1573_v33, %s2273_s29 }
  0x4b   : > { %661 = vrot.lane.b32.xlu1 %v1011_v6, %s2274_s30  ;;  %647 = vrot.lane.b32.xlu0 %v2426_v58, %s2274_s30  ;;  %v1440_v58 = vshll.u32 %v2569_v55, 16 }
  0x4d   : > { %v1442_v1 = vrot.slane %v1440_v58, 1 }
  0x4f   : > { %786 = vrot.lane.b32.xlu1 %v1171_v14, %s2271_s27  ;;  %772 = vrot.lane.b32.xlu0 %v1157_v12, %s2271_s27  ;;  %v2589_v6 = vsel %vm518_vm2, %v1438_v0, %v1442_v1  ;;  %v2603_v12 = vsel %vm736_vm1, %v1588_v49, %v1590_v10  ;;  %v2720_v0 = vld [vmem:[#allocation2 + $0x40] sm:$0xff] }
  0x53   : > { %877 = vrot.lane.b32.xlu1 %v2419_v56, %s2269_s25  ;;  %863 = vrot.lane.b32.xlu0 %v2363_v21, %s2269_s25  ;;  %v482_v21 = vld [vmem:[#allocation2 + $0x50] sm:$0xff] }
  0x54   : > { %497 = vst.msk [vmem:[#allocation3 + $0x50] sm:$0xff] %vm429_vm0, %v482_v21  ;;  %v2571_v56 = vld [vmem:[#allocation2 + $0x30] sm:$0xff]  ;;  %v2660_v21 = vrot.slane %v2624_v22, 1 }
  0x55   : > { %v1384_v61 = vshll.u32 %v2571_v56, 16  ;;  %v1576_v11 = vrot.slane %v2571_v56, 1  ;;  %v1388_v26 = vshrl.u32 %v2571_v56, 16 }
  0x56   : > { %v2676_v45 = vsel %vm736_vm1, %v1590_v10, %v2660_v21 }
  0x57   : > { %1078 = vrot.lane.b32.xlu1 %v1427_v27, %s2275_s7  ;;  %1064 = vrot.lane.b32.xlu0 %v1371_v28, %s2275_s7  ;;  %v2608_v13 = vsel %vm736_vm1, %v1574_v50, %v1576_v11  ;;  %v2682_v46 = vsel %vm736_vm1, %v1576_v11, %v2663_v41 }
  0x5b   : > { %1202 = vrot.lane.b32.xlu1 %v1587_v32, %s2272_s28  ;;  %1188 = vrot.lane.b32.xlu0 %v1573_v33, %s2272_s28 }
  0x5f   : > { %1293 = vrot.lane.b32.xlu1 %v2451_v4, %s2270_s26  ;;  %1279 = vrot.lane.b32.xlu0 %v2453_v5, %s2270_s26 }
  0x63   : > { %1494 = vrot.lane.b32.xlu1 %v1435_v47, %s2276_s8  ;;  %1480 = vrot.lane.b32.xlu0 %v1379_v48, %s2276_s8 }
  0x67   : > { %1618 = vrot.lane.b32.xlu1 %v1589_v51, %s2273_s29  ;;  %1604 = vrot.lane.b32.xlu0 %v1575_v52, %s2273_s29 }
  0x6b   : > { %663 = vrot.lane.b32.xlu1 %v1427_v27, %s2274_s30  ;;  %649 = vrot.lane.b32.xlu0 %v1371_v28, %s2274_s30  ;;  %v1392_v27 = vshll.u32 %v2434_v63, 16 }
  0x6f   : > { %788 = vrot.lane.b32.xlu1 %v1587_v32, %s2271_s27  ;;  %774 = vrot.lane.b32.xlu0 %v1573_v33, %s2271_s27  ;;  %v1446_v32 = vor.u32 %v1444_v23, %v1442_v1  ;;  %v2639_v33 = vrot.slane %v1448_v25, 1  ;;  %v1396_v1 = vshrl.u32 %v2434_v63, 16 }
  0x71   : > { %v2653_v39 = vsel %vm518_vm2, %v1446_v32, %v2639_v33 }
  0x73   : > { %879 = vrot.lane.b32.xlu1 %v2451_v4, %s2269_s25  ;;  %865 = vrot.lane.b32.xlu0 %v2453_v5, %s2269_s25  ;;  %v1386_v4 = vrot.slane %v1384_v61, 1  ;;  %v476_v5 = vld [vmem:[#allocation2 + $0x20] sm:$0xff] }
  0x74   : > { %491 = vst.msk [vmem:[#allocation3 + $0x20] sm:$0xff] %vm429_vm0, %v476_v5 }
  0x75   : > { %v2592_v9 = vsel %vm518_vm2, %v1382_v3, %v1386_v4  ;;  %v1390_v30 = vor.u32 %v1388_v26, %v1386_v4  ;;  %v1400_v3 = vshll.u32 %v2720_v0, 16 }
  0x77   : > { %1080 = vrot.lane.b32.xlu1 %v1435_v47, %s2275_s7  ;;  %1066 = vrot.lane.b32.xlu0 %v1379_v48, %s2275_s7 }
  0x7b   : > { %1204 = vrot.lane.b32.xlu1 %v1589_v51, %s2272_s28  ;;  %1190 = vrot.lane.b32.xlu0 %v1575_v52, %s2272_s28 }
  0x7f   : > { %1295 = vrot.lane.b32.xlu1 %v2531_v34, %s2270_s26  ;;  %1281 = vrot.lane.b32.xlu0 %v2533_v36, %s2270_s26 }
  0x83   : > { %1496 = vrot.lane.b32.xlu1 %v2589_v6, %s2276_s8  ;;  %1482 = vrot.lane.b32.xlu0 %v2592_v9, %s2276_s8 }
  0x87   : > { %1620 = vrot.lane.b32.xlu1 %v2603_v12, %s2273_s29  ;;  %1606 = vrot.lane.b32.xlu0 %v2608_v13, %s2273_s29 }
  0x8b   : > { %665 = vrot.lane.b32.xlu1 %v1435_v47, %s2274_s30  ;;  %651 = vrot.lane.b32.xlu0 %v1379_v48, %s2274_s30 }
  0x8d   : > { %v2616_v14 = vpop.permute.xlu0 %861  ;;  %v860_v15 = vpop.permute.xlu1 %859 }
  0x8f   : > { %790 = vrot.lane.b32.xlu1 %v1589_v51, %s2271_s27  ;;  %776 = vrot.lane.b32.xlu0 %v1575_v52, %s2271_s27 }
  0x91   : > { %v1276_v16 = vpop.permute.xlu1 %1275  ;;  %v769_v17 = vpop.permute.xlu0 %768 }
  0x93   : > { %881 = vrot.lane.b32.xlu1 %v2531_v34, %s2269_s25  ;;  %867 = vrot.lane.b32.xlu0 %v2533_v36, %s2269_s25  ;;  %v2641_v34 = vrot.slane %v1392_v27, 1  ;;  %v477_v36 = vld [vmem:[#allocation2 + $0x28] sm:$0xff] }
  0x94   : > { %492 = vst.msk [vmem:[#allocation3 + $0x28] sm:$0xff] %vm429_vm0, %v477_v36 }
  0x95   : > { %v876_v18 = vpop.permute.xlu1 %875  ;;  %v1185_v20 = vpop.permute.xlu0 %1184  ;;  %v2657_v40 = vsel %vm518_vm2, %v1390_v30, %v2641_v34  ;;  %v2745_v11 = vor.u32 %v1396_v1, %v2641_v34 }
  0x97   : > { %1082 = vrot.lane.b32.xlu1 %v2589_v6, %s2275_s7  ;;  %1068 = vrot.lane.b32.xlu0 %v2592_v9, %s2275_s7 }
  0x99   : > { %v1601_v28 = vpop.permute.xlu1 %1600  ;;  %v771_v29 = vpop.permute.xlu0 %770 }
  0x9b   : > { %1206 = vrot.lane.b32.xlu1 %v2603_v12, %s2272_s28  ;;  %1192 = vrot.lane.b32.xlu0 %v2608_v13, %s2272_s28 }
  0x9d   : > { %v785_v37 = vpop.permute.xlu1 %784  ;;  %v644_v38 = vpop.permute.xlu0 %643 }
  0x9e   : > { %689 = vst.msk [vmem:[#allocation3] sm:$0xff] %vm688_vm5, %v644_v38 }
  0x9f   : > { %814 = vst.msk [vmem:[#allocation3] sm:$0xff] %vm813_vm6, %v769_v17  ;;  %1297 = vrot.lane.b32.xlu1 %v2569_v55, %s2270_s26  ;;  %1283 = vrot.lane.b32.xlu0 %v2571_v56, %s2270_s26 }
  0xa0   : > { %905 = vst.msk [vmem:[#allocation3] sm:$0xff] %vm904_vm7, %v860_v15 }
  0xa1   : > { %v1061_v42 = vpop.permute.xlu1 %1060  ;;  %v1477_v44 = vpop.permute.xlu0 %1476 }
  0xa2   : > { %1106 = vst.msk [vmem:[#allocation3] sm:$0xff] %vm1105_vm8, %v1061_v42 }
  0xa3   : > { %1230 = vst.msk [vmem:[#allocation3] sm:$0xff] %vm1229_vm9, %v1185_v20  ;;  %1498 = vrot.lane.b32.xlu1 %v2653_v39, %s2276_s8  ;;  %1484 = vrot.lane.b32.xlu0 %v2657_v40, %s2276_s8  ;;  %v2766_v20 = vrot.slane %v2720_v0, 1 }
  0xa4   : > { %1321 = vst.msk [vmem:[#allocation3] sm:$0xff] %vm1320_vm10, %v1276_v16 }
  0xa5   : > { %1522 = vst.msk [vmem:[#allocation3] sm:$0xff] %vm1521_vm11, %v1477_v44  ;;  %v660_v47 = vpop.permute.xlu1 %659  ;;  %v646_v48 = vpop.permute.xlu0 %645  ;;  %v1460_v44 = vshrl.u32 %v2718_v62, 16 }
  0xa6   : > { %1646 = vst.msk [vmem:[#allocation3] sm:$0xff] %vm1645_vm12, %v1601_v28 }
  0xa7   : > { %697 = vst.msk [vmem:[#allocation3 + $0x40] sm:$0xff] %vm688_vm5, %v660_v47  ;;  %690 = vst.msk [vmem:[#allocation3 + $0x8] sm:$0xff] %vm688_vm5, %v646_v48  ;;  %1622 = vrot.lane.b32.xlu1 %v2676_v45, %s2273_s29  ;;  %1608 = vrot.lane.b32.xlu0 %v2682_v46, %s2273_s29  ;;  %v486_v48 = vld [vmem:[#allocation2 + $0x70] sm:$0xff] }
  0xa8   : > { %822 = vst.msk [vmem:[#allocation3 + $0x40] sm:$0xff] %vm813_vm6, %v785_v37  ;;  %815 = vst.msk [vmem:[#allocation3 + $0x8] sm:$0xff] %vm813_vm6, %v771_v29  ;;  %v1581_v29 = vsel %vm736_vm1, %v2663_v41, %v2766_v20 }
  0xa9   : > { %913 = vst.msk [vmem:[#allocation3 + $0x40] sm:$0xff] %vm904_vm7, %v876_v18  ;;  %906 = vst.msk [vmem:[#allocation3 + $0x8] sm:$0xff] %vm904_vm7, %v2616_v14  ;;  %v1077_v49 = vpop.permute.xlu1 %1076  ;;  %v1063_v50 = vpop.permute.xlu0 %1062  ;;  %v2763_v18 = vrot.slane %v2718_v62, 1 }
  0xaa   : > { %1114 = vst.msk [vmem:[#allocation3 + $0x40] sm:$0xff] %vm1105_vm8, %v1077_v49  ;;  %1107 = vst.msk [vmem:[#allocation3 + $0x8] sm:$0xff] %vm1105_vm8, %v1063_v50 }
  0xab   : > { %667 = vrot.lane.b32.xlu1 %v2589_v6, %s2274_s30  ;;  %653 = vrot.lane.b32.xlu0 %v2592_v9, %s2274_s30  ;;  %v485_v6 = vld [vmem:[#allocation2 + $0x68] sm:$0xff]  ;;  %v1595_v28 = vsel %vm736_vm1, %v2660_v21, %v2763_v18  ;;  %501 = vst.msk [vmem:[#allocation3 + $0x70] sm:$0xff] %vm429_vm0, %v486_v48 }
  0xac   : > { %500 = vst.msk [vmem:[#allocation3 + $0x68] sm:$0xff] %vm429_vm0, %v485_v6 }
  0xad   : > { %v1201_v51 = vpop.permute.xlu1 %1200  ;;  %v1187_v52 = vpop.permute.xlu0 %1186  ;;  %v1661_v53 = vld [vmem:[#allocation3] sm:$0xff] }
  0xae   : > { %1238 = vst.msk [vmem:[#allocation3 + $0x40] sm:$0xff] %vm1229_vm9, %v1201_v51  ;;  %1231 = vst.msk [vmem:[#allocation3 + $0x8] sm:$0xff] %vm1229_vm9, %v1187_v52  ;;  %2125 = vmatmul.mubr.msk.bf16.vlgmr.msra.gmra.mrb[0].mxu0 %vm1703_vm13, %v1661_v53 }
  0xaf   : > { %792 = vrot.lane.b32.xlu1 %v2603_v12, %s2271_s27  ;;  %778 = vrot.lane.b32.xlu0 %v2608_v13, %s2271_s27  ;;  %v2747_v12 = vrot.slane %v1400_v3, 1  ;;  %v478_v13 = vld [vmem:[#allocation2 + $0x30] sm:$0xff] }
  0xb0   : > { %2128 = vmatprep.mubr.msk.bf16.mxu0 %vm2278_vm3, %v2277_v8  ;;  %493 = vst.msk [vmem:[#allocation3 + $0x30] sm:$0xff] %vm429_vm0, %v478_v13 }
  0xb1   : > { %v1292_v57 = vpop.permute.xlu1 %1291  ;;  %v1278_v58 = vpop.permute.xlu0 %1277  ;;  %v1403_v17 = vsel %vm518_vm2, %v2745_v11, %v2747_v12 }
  0xb2   : > { %1329 = vst.msk [vmem:[#allocation3 + $0x40] sm:$0xff] %vm1320_vm10, %v1292_v57  ;;  %1322 = vst.msk [vmem:[#allocation3 + $0x8] sm:$0xff] %vm1320_vm10, %v1278_v58  ;;  %v517_v58 = vld [vmem:[#allocation2 + $0x78] sm:$0x1] }
  0xb3   : > { %883 = vrot.lane.b32.xlu1 %v2569_v55, %s2269_s25  ;;  %869 = vrot.lane.b32.xlu0 %v2571_v56, %s2269_s25  ;;  %v1452_v55 = vshrl.u32 %v2624_v22, 16  ;;  %v1456_v56 = vshll.u32 %v2718_v62, 16  ;;  %v639_v1 = vshll.u32 %v517_v58, 16 }
  0xb5   : > { %v1493_v59 = vpop.permute.xlu1 %1492  ;;  %v1479_v61 = vpop.permute.xlu0 %1478  ;;  %v2740_v9 = vor.u32 %v1452_v55, %v2639_v33  ;;  %v2742_v10 = vrot.slane %v1456_v56, 1  ;;  %v1582_v56 = vrot.slane %v2498_v19, 1  ;;  %v641_v13 = vrot.slane %v639_v1, 1 }
  0xb6   : > { %1530 = vst.msk [vmem:[#allocation3 + $0x40] sm:$0xff] %vm1521_vm11, %v1493_v59  ;;  %1523 = vst.msk [vmem:[#allocation3 + $0x8] sm:$0xff] %vm1521_vm11, %v1479_v61 }
  0xb7   : > { %1084 = vrot.lane.b32.xlu1 %v2653_v39, %s2275_s7  ;;  %1070 = vrot.lane.b32.xlu0 %v2657_v40, %s2275_s7  ;;  %v1459_v16 = vsel %vm518_vm2, %v2740_v9, %v2742_v10  ;;  %v2821_v49 = vor.u32 %v1460_v44, %v2742_v10 }
  0xb9   : > { %v1617_v4 = vpop.permute.xlu1 %1616  ;;  %v1603_v5 = vpop.permute.xlu0 %1602 }
  0xba   : > { %1654 = vst.msk [vmem:[#allocation3 + $0x40] sm:$0xff] %vm1645_vm12, %v1617_v4  ;;  %1647 = vst.msk [vmem:[#allocation3 + $0x8] sm:$0xff] %vm1645_vm12, %v1603_v5 }
  0xbb   : > { %1208 = vrot.lane.b32.xlu1 %v2676_v45, %s2272_s28  ;;  %1194 = vrot.lane.b32.xlu0 %v2682_v46, %s2272_s28 }
  0xbd   : > { %v662_v14 = vpop.permute.xlu1 %661  ;;  %v648_v15 = vpop.permute.xlu0 %647 }
  0xbe   : > { %698 = vst.msk [vmem:[#allocation3 + $0x48] sm:$0xff] %vm688_vm5, %v662_v14  ;;  %691 = vst.msk [vmem:[#allocation3 + $0x10] sm:$0xff] %vm688_vm5, %v648_v15 }
  0xbf   : > { %1299 = vrot.lane.b32.xlu1 %v2624_v22, %s2270_s26  ;;  %1285 = vrot.lane.b32.xlu0 %v2434_v63, %s2270_s26 }
  0xc1   : > { %v787_v23 = vpop.permute.xlu1 %786  ;;  %v773_v25 = vpop.permute.xlu0 %772  ;;  %v1662_v26 = vld [vmem:[#allocation3 + $0x8] sm:$0xff]  ;;  %v1669_v27 = vld [vmem:[#allocation3 + $0x40] sm:$0xff] }
  0xc2   : > { %823 = vst.msk [vmem:[#allocation3 + $0x48] sm:$0xff] %vm813_vm6, %v787_v23  ;;  %816 = vst.msk [vmem:[#allocation3 + $0x10] sm:$0xff] %vm813_vm6, %v773_v25  ;;  %2129 = vmatmul.mubr.msk.bf16.gmra.mrb[4].mxu0 %vm1703_vm13, %v1662_v26  ;;  %2157 = vmatmul.mubr.msk.bf16.vlgmr.msra.gmra.mrb[0].mxu1 %vm1703_vm13, %v1669_v27  ;;  %v586_v23 = vsel %vm518_vm2, %v2745_v11, %v2416_v54  ;;  %v753_v54 = vsel %vm736_vm1, %v2663_v41, %v752_v43 }
  0xc3   : > { %1500 = vrot.lane.b32.xlu1 %v1459_v16, %s2276_s8  ;;  %1486 = vrot.lane.b32.xlu0 %v1403_v17, %s2276_s8 }
  0xc4   : > { %2160 = vmatprep.mubr.msk.bf16.mxu1 %vm2278_vm3, %v2277_v8  ;;  %2132 = vmatprep.mubr.msk.bf16.mxu0 %vm2278_vm3, %v2277_v8 }
  0xc5   : > { %v878_v31 = vpop.permute.xlu1 %877  ;;  %v864_v32 = vpop.permute.xlu0 %863 }
  0xc6   : > { %914 = vst.msk [vmem:[#allocation3 + $0x48] sm:$0xff] %vm904_vm7, %v878_v31  ;;  %907 = vst.msk [vmem:[#allocation3 + $0x10] sm:$0xff] %vm904_vm7, %v864_v32 }
  0xc7   : > { %1624 = vrot.lane.b32.xlu1 %v1595_v28, %s2273_s29  ;;  %1610 = vrot.lane.b32.xlu0 %v1581_v29, %s2273_s29 }
  0xc9   : > { %v1079_v33 = vpop.permute.xlu1 %1078  ;;  %v1065_v30 = vpop.permute.xlu0 %1064 }
  0xca   : > { %1115 = vst.msk [vmem:[#allocation3 + $0x48] sm:$0xff] %vm1105_vm8, %v1079_v33  ;;  %1108 = vst.msk [vmem:[#allocation3 + $0x10] sm:$0xff] %vm1105_vm8, %v1065_v30  ;;  %v1136_v33 = vld [vmem:[#allocation2 + $0x80] sm:$0x1] }
  0xcb   : > { %669 = vrot.lane.b32.xlu1 %v2653_v39, %s2274_s30  ;;  %655 = vrot.lane.b32.xlu0 %v2657_v40, %s2274_s30  ;;  %v2806_v39 = vld [vmem:[#allocation2 + $0x80] sm:$0xff]  ;;  %v1182_v24 = vrot.slane %v1136_v33, 1 }
  0xcc   : > { %v1596_v55 = vrot.slane %v2806_v39, 1 }
  0xcd   : > { %v1203_v34 = vpop.permute.xlu1 %1202  ;;  %v1189_v36 = vpop.permute.xlu0 %1188 }
  0xce   : > { %1239 = vst.msk [vmem:[#allocation3 + $0x48] sm:$0xff] %vm1229_vm9, %v1203_v34  ;;  %1232 = vst.msk [vmem:[#allocation3 + $0x10] sm:$0xff] %vm1229_vm9, %v1189_v36  ;;  %v1597_v10 = vsel %vm736_vm1, %v2763_v18, %v1596_v55 }
  0xcf   : > { %794 = vrot.lane.b32.xlu1 %v2676_v45, %s2271_s27  ;;  %780 = vrot.lane.b32.xlu0 %v2682_v46, %s2271_s27  ;;  %v1464_v45 = vshll.u32 %v2806_v39, 16 }
  0xd1   : > { %v1294_v37 = vpop.permute.xlu1 %1293  ;;  %v1280_v38 = vpop.permute.xlu0 %1279  ;;  %v2823_v50 = vrot.slane %v1464_v45, 1 }
  0xd2   : > { %1330 = vst.msk [vmem:[#allocation3 + $0x48] sm:$0xff] %vm1320_vm10, %v1294_v37  ;;  %1323 = vst.msk [vmem:[#allocation3 + $0x10] sm:$0xff] %vm1320_vm10, %v1280_v38  ;;  %v1351_v37 = vld [vmem:[#allocation2 + $0x88] sm:$0x1] }
  0xd3   : > { %885 = vrot.lane.b32.xlu1 %v2624_v22, %s2269_s25  ;;  %871 = vrot.lane.b32.xlu0 %v2434_v63, %s2269_s25  ;;  %v1404_v22 = vshrl.u32 %v2720_v0, 16  ;;  %v1408_v63 = vshll.u32 %v2498_v19, 16  ;;  %v1467_v59 = vsel %vm518_vm2, %v2821_v49, %v2823_v50  ;;  %v1472_v38 = vshll.u32 %v1351_v37, 16 }
  0xd5   : > { %v1495_v40 = vpop.permute.xlu1 %1494  ;;  %v1481_v42 = vpop.permute.xlu0 %1480  ;;  %v2827_v51 = vor.u32 %v1404_v22, %v2747_v12  ;;  %v2829_v52 = vrot.slane %v1408_v63, 1  ;;  %v1583_v12 = vsel %vm736_vm1, %v2766_v20, %v1582_v56  ;;  %v1474_v45 = vrot.slane %v1472_v38, 1  ;;  %v1552_v63 = vld [vmem:[#allocation2 + $0x88] sm:$0x1] }
  0xd6   : > { %1531 = vst.msk [vmem:[#allocation3 + $0x48] sm:$0xff] %vm1521_vm11, %v1495_v40  ;;  %1524 = vst.msk [vmem:[#allocation3 + $0x10] sm:$0xff] %vm1521_vm11, %v1481_v42  ;;  %v1412_v40 = vshrl.u32 %v2498_v19, 16  ;;  %v1598_v48 = vrot.slane %v1552_v63, 1 }
  0xd7   : > { %1086 = vrot.lane.b32.xlu1 %v1459_v16, %s2275_s7  ;;  %1072 = vrot.lane.b32.xlu0 %v1403_v17, %s2275_s7  ;;  %v1411_v61 = vsel %vm518_vm2, %v2827_v51, %v2829_v52  ;;  %v719_v16 = vld [vmem:[#allocation2 + $0x78] sm:$0x1]  ;;  %v642_v17 = vsel %vm518_vm2, %v2740_v9, %v641_v13  ;;  %v1003_v41 = vsel %vm518_vm2, %v2827_v51, %v2430_v60  ;;  %v1468_v60 = vshrl.u32 %v2806_v39, 16 }
  0xd8   : > { %v766_v25 = vrot.slane %v719_v16, 1 }
  0xd9   : > { %v1619_v46 = vpop.permute.xlu1 %1618  ;;  %v1605_v47 = vpop.permute.xlu0 %1604 }
  0xda   : > { %1655 = vst.msk [vmem:[#allocation3 + $0x48] sm:$0xff] %vm1645_vm12, %v1619_v46  ;;  %1648 = vst.msk [vmem:[#allocation3 + $0x10] sm:$0xff] %vm1645_vm12, %v1605_v47 }
  0xdb   : > { %1210 = vrot.lane.b32.xlu1 %v1595_v28, %s2272_s28  ;;  %1196 = vrot.lane.b32.xlu0 %v1581_v29, %s2272_s28  ;;  %v935_v28 = vld [vmem:[#allocation2 + $0x80] sm:$0x1]  ;;  %v767_v29 = vsel %vm736_vm1, %v2660_v21, %v766_v25 }
  0xdc   : > { %v1056_v9 = vshll.u32 %v935_v28, 16 }
  0xdd   : > { %v664_v53 = vpop.permute.xlu1 %663  ;;  %v650_v57 = vpop.permute.xlu0 %649 }
  0xde   : > { %699 = vst.msk [vmem:[#allocation3 + $0x50] sm:$0xff] %vm688_vm5, %v664_v53  ;;  %692 = vst.msk [vmem:[#allocation3 + $0x18] sm:$0xff] %vm688_vm5, %v650_v57  ;;  %v1058_v32 = vrot.slane %v1056_v9, 1  ;;  %v1585_v53 = vsel %vm736_vm1, %v1582_v56, %v2463_v7 }
  0xdf   : > { %1301 = vrot.lane.b32.xlu1 %v2718_v62, %s2270_s26  ;;  %1287 = vrot.lane.b32.xlu0 %v2720_v0, %s2270_s26 }
  0xe0   : > { %v1059_v43 = vsel %vm518_vm2, %v2821_v49, %v1058_v32 }
  0xe1   : > { %v789_v3 = vpop.permute.xlu1 %788  ;;  %v775_v4 = vpop.permute.xlu0 %774  ;;  %v1663_v5 = vld [vmem:[#allocation3 + $0x10] sm:$0xff]  ;;  %v1670_v6 = vld [vmem:[#allocation3 + $0x48] sm:$0xff] }
  0xe2   : > { %824 = vst.msk [vmem:[#allocation3 + $0x50] sm:$0xff] %vm813_vm6, %v789_v3  ;;  %817 = vst.msk [vmem:[#allocation3 + $0x18] sm:$0xff] %vm813_vm6, %v775_v4  ;;  %2133 = vmatmul.mubr.msk.bf16.gmra.mrb[8].mxu0 %vm1703_vm13, %v1663_v5  ;;  %2161 = vmatmul.mubr.msk.bf16.gmra.mrb[4].mxu1 %vm1703_vm13, %v1670_v6 }
  0xe3   : > { %1502 = vrot.lane.b32.xlu1 %v1467_v59, %s2276_s8  ;;  %1488 = vrot.lane.b32.xlu0 %v1411_v61, %s2276_s8 }
  0xe4   : > { %2164 = vmatprep.mubr.msk.bf16.mxu1 %vm2278_vm3, %v2277_v8  ;;  %2136 = vmatprep.mubr.msk.bf16.mxu0 %vm2278_vm3, %v2277_v8 }
  0xe5   : > { %v880_v14 = vpop.permute.xlu1 %879  ;;  %v866_v15 = vpop.permute.xlu0 %865 }
  0xe6   : > { %915 = vst.msk [vmem:[#allocation3 + $0x50] sm:$0xff] %vm904_vm7, %v880_v14  ;;  %908 = vst.msk [vmem:[#allocation3 + $0x18] sm:$0xff] %vm904_vm7, %v866_v15 }
  0xe7   : > { %1626 = vrot.lane.b32.xlu1 %v1597_v10, %s2273_s29  ;;  %1612 = vrot.lane.b32.xlu0 %v1583_v12, %s2273_s29 }
  0xe9   : > { %v1081_v26 = vpop.permute.xlu1 %1080  ;;  %v1067_v27 = vpop.permute.xlu0 %1066 }
  0xea   : > { %1116 = vst.msk [vmem:[#allocation3 + $0x50] sm:$0xff] %vm1105_vm8, %v1081_v26  ;;  %1109 = vst.msk [vmem:[#allocation3 + $0x18] sm:$0xff] %vm1105_vm8, %v1067_v27 }
  0xeb   : > { %671 = vrot.lane.b32.xlu1 %v642_v17, %s2274_s30  ;;  %657 = vrot.lane.b32.xlu0 %v586_v23, %s2274_s30 }
  0xed   : > { %v1205_v11 = vpop.permute.xlu1 %1204  ;;  %v1191_v31 = vpop.permute.xlu0 %1190 }
  0xee   : > { %1240 = vst.msk [vmem:[#allocation3 + $0x50] sm:$0xff] %vm1229_vm9, %v1205_v11  ;;  %1233 = vst.msk [vmem:[#allocation3 + $0x18] sm:$0xff] %vm1229_vm9, %v1191_v31 }
  0xef   : > { %796 = vrot.lane.b32.xlu1 %v767_v29, %s2271_s27  ;;  %782 = vrot.lane.b32.xlu0 %v753_v54, %s2271_s27 }
  0xf1   : > { %v1296_v30 = vpop.permute.xlu1 %1295  ;;  %v1282_v21 = vpop.permute.xlu0 %1281 }
  0xf2   : > { %1331 = vst.msk [vmem:[#allocation3 + $0x50] sm:$0xff] %vm1320_vm10, %v1296_v30  ;;  %1324 = vst.msk [vmem:[#allocation3 + $0x18] sm:$0xff] %vm1320_vm10, %v1282_v21 }
  0xf3   : > { %887 = vrot.lane.b32.xlu1 %v2718_v62, %s2269_s25  ;;  %873 = vrot.lane.b32.xlu0 %v2720_v0, %s2269_s25  ;;  %v1183_v62 = vsel %vm736_vm1, %v2763_v18, %v1182_v24  ;;  %v1169_v0 = vsel %vm736_vm1, %v2766_v20, %v2386_v35  ;;  %v1470_v18 = vor.u32 %v1468_v60, %v2823_v50 }
  0xf4   : > { %v1414_v35 = vor.u32 %v1412_v40, %v2829_v52 }
  0xf5   : > { %v1497_v34 = vpop.permute.xlu1 %1496  ;;  %v1483_v36 = vpop.permute.xlu0 %1482  ;;  %v1475_v46 = vsel %vm518_vm2, %v1470_v18, %v1474_v45 }
  0xf6   : > { %1532 = vst.msk [vmem:[#allocation3 + $0x50] sm:$0xff] %vm1521_vm11, %v1497_v34  ;;  %1525 = vst.msk [vmem:[#allocation3 + $0x18] sm:$0xff] %vm1521_vm11, %v1483_v36  ;;  %v1419_v47 = vsel %vm518_vm2, %v1414_v35, %v2444_v2  ;;  %v1599_v2 = vsel %vm736_vm1, %v1596_v55, %v1598_v48 }
  0xf7   : > { %1088 = vrot.lane.b32.xlu1 %v1059_v43, %s2275_s7  ;;  %1074 = vrot.lane.b32.xlu0 %v1003_v41, %s2275_s7 }
  0xf9   : > { %v1621_v42 = vpop.permute.xlu1 %1620  ;;  %v1607_v44 = vpop.permute.xlu0 %1606 }
  0xfa   : > { %1656 = vst.msk [vmem:[#allocation3 + $0x50] sm:$0xff] %vm1645_vm12, %v1621_v42  ;;  %1649 = vst.msk [vmem:[#allocation3 + $0x18] sm:$0xff] %vm1645_vm12, %v1607_v44 }
  0xfb   : > { %1212 = vrot.lane.b32.xlu1 %v1183_v62, %s2272_s28  ;;  %1198 = vrot.lane.b32.xlu0 %v1169_v0, %s2272_s28  ;;  %s3030_s28 = scalar_lea.vmem %s3107_s4, %s2060_s23 }
  0xfd   : > { %v666_v20 = vpop.permute.xlu1 %665  ;;  %v652_v22 = vpop.permute.xlu0 %651 }
  0xfe   : > { %700 = vst.msk [vmem:[#allocation3 + $0x58] sm:$0xff] %vm688_vm5, %v666_v20  ;;  %693 = vst.msk [vmem:[#allocation3 + $0x20] sm:$0xff] %vm688_vm5, %v652_v22 }
  0xff   : > { %1303 = vrot.lane.b32.xlu1 %v2806_v39, %s2270_s26  ;;  %1289 = vrot.lane.b32.xlu0 %v2498_v19, %s2270_s26 }
 0x101   : > { %v791_v49 = vpop.permute.xlu1 %790  ;;  %v777_v50 = vpop.permute.xlu0 %776  ;;  %v1664_v51 = vld [vmem:[#allocation3 + $0x18] sm:$0xff]  ;;  %v1671_v52 = vld [vmem:[#allocation3 + $0x50] sm:$0xff] }
 0x102   : > { %825 = vst.msk [vmem:[#allocation3 + $0x58] sm:$0xff] %vm813_vm6, %v791_v49  ;;  %818 = vst.msk [vmem:[#allocation3 + $0x20] sm:$0xff] %vm813_vm6, %v777_v50  ;;  %2137 = vmatmul.mubr.msk.bf16.gmra.mrb[12].mxu0 %vm1703_vm13, %v1664_v51  ;;  %2165 = vmatmul.mubr.msk.bf16.gmra.mrb[8].mxu1 %vm1703_vm13, %v1671_v52 }
 0x103   : > { %1504 = vrot.lane.b32.xlu1 %v1475_v46, %s2276_s8  ;;  %1490 = vrot.lane.b32.xlu0 %v1419_v47, %s2276_s8 }
 0x104   : > { %2168 = vmatprep.mubr.msk.bf16.mxu1 %vm2278_vm3, %v2277_v8  ;;  %2140 = vmatprep.mubr.msk.bf16.mxu0 %vm2278_vm3, %v2277_v8 }
 0x105   : > { %v882_v57 = vpop.permute.xlu1 %881  ;;  %v868_v58 = vpop.permute.xlu0 %867 }
 0x106   : > { %916 = vst.msk [vmem:[#allocation3 + $0x58] sm:$0xff] %vm904_vm7, %v882_v57  ;;  %909 = vst.msk [vmem:[#allocation3 + $0x20] sm:$0xff] %vm904_vm7, %v868_v58 }
 0x107   : > { %1628 = vrot.lane.b32.xlu1 %v1599_v2, %s2273_s29  ;;  %1614 = vrot.lane.b32.xlu0 %v1585_v53, %s2273_s29 }
 0x109   : > { %v1083_v39 = vpop.permute.xlu1 %1082  ;;  %v1069_v19 = vpop.permute.xlu0 %1068 }
 0x10a   : > { %1117 = vst.msk [vmem:[#allocation3 + $0x58] sm:$0xff] %vm1105_vm8, %v1083_v39  ;;  %1110 = vst.msk [vmem:[#allocation3 + $0x20] sm:$0xff] %vm1105_vm8, %v1069_v19  ;;  %v3025_v39 = vld [vmem:[%s3106_s3] ss:$0 sm:$0xff] }
 0x10d   : > { %v1207_v7 = vpop.permute.xlu1 %1206  ;;  %v1193_v59 = vpop.permute.xlu0 %1192 }
 0x10e   : > { %1241 = vst.msk [vmem:[#allocation3 + $0x58] sm:$0xff] %vm1229_vm9, %v1207_v7  ;;  %1234 = vst.msk [vmem:[#allocation3 + $0x20] sm:$0xff] %vm1229_vm9, %v1193_v59 }
 0x111   : > { %v1298_v61 = vpop.permute.xlu1 %1297  ;;  %v1284_v55 = vpop.permute.xlu0 %1283 }
 0x112   : > { %1332 = vst.msk [vmem:[#allocation3 + $0x58] sm:$0xff] %vm1320_vm10, %v1298_v61  ;;  %1325 = vst.msk [vmem:[#allocation3 + $0x20] sm:$0xff] %vm1320_vm10, %v1284_v55 }
 0x115   : > { %v1499_v56 = vpop.permute.xlu1 %1498  ;;  %v1485_v1 = vpop.permute.xlu0 %1484 }
 0x116   : > { %1533 = vst.msk [vmem:[#allocation3 + $0x58] sm:$0xff] %vm1521_vm11, %v1499_v56  ;;  %1526 = vst.msk [vmem:[#allocation3 + $0x20] sm:$0xff] %vm1521_vm11, %v1485_v1 }
 0x119   : > { %v1623_v3 = vpop.permute.xlu1 %1622  ;;  %v1609_v4 = vpop.permute.xlu0 %1608 }
 0x11a   : > { %1657 = vst.msk [vmem:[#allocation3 + $0x58] sm:$0xff] %vm1645_vm12, %v1623_v3  ;;  %1650 = vst.msk [vmem:[#allocation3 + $0x20] sm:$0xff] %vm1645_vm12, %v1609_v4 }
 0x11d   : > { %v668_v5 = vpop.permute.xlu1 %667  ;;  %v654_v6 = vpop.permute.xlu0 %653 }
 0x11e   : > { %701 = vst.msk [vmem:[#allocation3 + $0x60] sm:$0xff] %vm688_vm5, %v668_v5  ;;  %694 = vst.msk [vmem:[#allocation3 + $0x28] sm:$0xff] %vm688_vm5, %v654_v6 }
 0x121   : > { %v793_v10 = vpop.permute.xlu1 %792  ;;  %v779_v12 = vpop.permute.xlu0 %778  ;;  %v1665_v13 = vld [vmem:[#allocation3 + $0x20] sm:$0xff]  ;;  %v1672_v14 = vld [vmem:[#allocation3 + $0x58] sm:$0xff] }
 0x122   : > { %826 = vst.msk [vmem:[#allocation3 + $0x60] sm:$0xff] %vm813_vm6, %v793_v10  ;;  %819 = vst.msk [vmem:[#allocation3 + $0x28] sm:$0xff] %vm813_vm6, %v779_v12  ;;  %2141 = vmatmul.mubr.msk.bf16.gmra.mrb[16].mxu0 %vm1703_vm13, %v1665_v13  ;;  %2169 = vmatmul.mubr.msk.bf16.gmra.mrb[12].mxu1 %vm1703_vm13, %v1672_v14 }
 0x123   : > { %2172 = vmatprep.mubr.msk.bf16.mxu1 %vm2278_vm3, %v2277_v8  ;;  %2144 = vmatprep.mubr.msk.bf16.mxu0 %vm2278_vm3, %v2277_v8 }
 0x125   : > { %v884_v15 = vpop.permute.xlu1 %883  ;;  %v870_v16 = vpop.permute.xlu0 %869 }
 0x126   : > { %917 = vst.msk [vmem:[#allocation3 + $0x60] sm:$0xff] %vm904_vm7, %v884_v15  ;;  %910 = vst.msk [vmem:[#allocation3 + $0x28] sm:$0xff] %vm904_vm7, %v870_v16 }
 0x129   : > { %v1085_v17 = vpop.permute.xlu1 %1084  ;;  %v1071_v23 = vpop.permute.xlu0 %1070 }
 0x12a   : > { %1118 = vst.msk [vmem:[#allocation3 + $0x60] sm:$0xff] %vm1105_vm8, %v1085_v17  ;;  %1111 = vst.msk [vmem:[#allocation3 + $0x28] sm:$0xff] %vm1105_vm8, %v1071_v23 }
 0x12d   : > { %v1209_v25 = vpop.permute.xlu1 %1208  ;;  %v1195_v26 = vpop.permute.xlu0 %1194 }
 0x12e   : > { %1242 = vst.msk [vmem:[#allocation3 + $0x60] sm:$0xff] %vm1229_vm9, %v1209_v25  ;;  %1235 = vst.msk [vmem:[#allocation3 + $0x28] sm:$0xff] %vm1229_vm9, %v1195_v26 }
 0x131   : > { %v1300_v27 = vpop.permute.xlu1 %1299  ;;  %v1286_v28 = vpop.permute.xlu0 %1285 }
 0x132   : > { %1333 = vst.msk [vmem:[#allocation3 + $0x60] sm:$0xff] %vm1320_vm10, %v1300_v27  ;;  %1326 = vst.msk [vmem:[#allocation3 + $0x28] sm:$0xff] %vm1320_vm10, %v1286_v28 }
 0x135   : > { %v1501_v29 = vpop.permute.xlu1 %1500  ;;  %v1487_v54 = vpop.permute.xlu0 %1486 }
 0x136   : > { %1534 = vst.msk [vmem:[#allocation3 + $0x60] sm:$0xff] %vm1521_vm11, %v1501_v29  ;;  %1527 = vst.msk [vmem:[#allocation3 + $0x28] sm:$0xff] %vm1521_vm11, %v1487_v54 }
 0x139   : > { %v1625_v9 = vpop.permute.xlu1 %1624  ;;  %v1611_v11 = vpop.permute.xlu0 %1610 }
 0x13a   : > { %1658 = vst.msk [vmem:[#allocation3 + $0x60] sm:$0xff] %vm1645_vm12, %v1625_v9  ;;  %1651 = vst.msk [vmem:[#allocation3 + $0x28] sm:$0xff] %vm1645_vm12, %v1611_v11 }
 0x13d   : > { %v670_v31 = vpop.permute.xlu1 %669  ;;  %v656_v32 = vpop.permute.xlu0 %655 }
 0x13e   : > { %702 = vst.msk [vmem:[#allocation3 + $0x68] sm:$0xff] %vm688_vm5, %v670_v31  ;;  %695 = vst.msk [vmem:[#allocation3 + $0x30] sm:$0xff] %vm688_vm5, %v656_v32 }
 0x141   : > { %v795_v33 = vpop.permute.xlu1 %794  ;;  %v781_v30 = vpop.permute.xlu0 %780  ;;  %v1666_v21 = vld [vmem:[#allocation3 + $0x28] sm:$0xff]  ;;  %v1673_v24 = vld [vmem:[#allocation3 + $0x60] sm:$0xff] }
 0x142   : > { %827 = vst.msk [vmem:[#allocation3 + $0x68] sm:$0xff] %vm813_vm6, %v795_v33  ;;  %820 = vst.msk [vmem:[#allocation3 + $0x30] sm:$0xff] %vm813_vm6, %v781_v30  ;;  %2145 = vmatmul.mubr.msk.bf16.gmra.mrb[20].mxu0 %vm1703_vm13, %v1666_v21  ;;  %2173 = vmatmul.mubr.msk.bf16.gmra.mrb[16].mxu1 %vm1703_vm13, %v1673_v24 }
 0x143   : > { %2176 = vmatprep.mubr.msk.bf16.mxu1 %vm2278_vm3, %v2277_v8  ;;  %2148 = vmatprep.mubr.msk.bf16.mxu0 %vm2278_vm3, %v2277_v8 }
 0x145   : > { %v886_v43 = vpop.permute.xlu1 %885  ;;  %v872_v41 = vpop.permute.xlu0 %871 }
 0x146   : > { %918 = vst.msk [vmem:[#allocation3 + $0x68] sm:$0xff] %vm904_vm7, %v886_v43  ;;  %911 = vst.msk [vmem:[#allocation3 + $0x30] sm:$0xff] %vm904_vm7, %v872_v41 }
 0x149   : > { %v1087_v34 = vpop.permute.xlu1 %1086  ;;  %v1073_v36 = vpop.permute.xlu0 %1072 }
 0x14a   : > { %1119 = vst.msk [vmem:[#allocation3 + $0x68] sm:$0xff] %vm1105_vm8, %v1087_v34  ;;  %1112 = vst.msk [vmem:[#allocation3 + $0x30] sm:$0xff] %vm1105_vm8, %v1073_v36 }
 0x14d   : > { %v1211_v37 = vpop.permute.xlu1 %1210  ;;  %v1197_v62 = vpop.permute.xlu0 %1196 }
 0x14e   : > { %1243 = vst.msk [vmem:[#allocation3 + $0x68] sm:$0xff] %vm1229_vm9, %v1211_v37  ;;  %1236 = vst.msk [vmem:[#allocation3 + $0x30] sm:$0xff] %vm1229_vm9, %v1197_v62 }
 0x151   : > { %v1302_v0 = vpop.permute.xlu1 %1301  ;;  %v1288_v60 = vpop.permute.xlu0 %1287 }
 0x152   : > { %1334 = vst.msk [vmem:[#allocation3 + $0x68] sm:$0xff] %vm1320_vm10, %v1302_v0  ;;  %1327 = vst.msk [vmem:[#allocation3 + $0x30] sm:$0xff] %vm1320_vm10, %v1288_v60 }
 0x155   : > { %v1503_v38 = vpop.permute.xlu1 %1502  ;;  %v1489_v40 = vpop.permute.xlu0 %1488 }
 0x156   : > { %1535 = vst.msk [vmem:[#allocation3 + $0x68] sm:$0xff] %vm1521_vm11, %v1503_v38  ;;  %1528 = vst.msk [vmem:[#allocation3 + $0x30] sm:$0xff] %vm1521_vm11, %v1489_v40 }
 0x159   : > { %v1627_v42 = vpop.permute.xlu1 %1626  ;;  %v1613_v44 = vpop.permute.xlu0 %1612 }
 0x15a   : > { %1659 = vst.msk [vmem:[#allocation3 + $0x68] sm:$0xff] %vm1645_vm12, %v1627_v42  ;;  %1652 = vst.msk [vmem:[#allocation3 + $0x30] sm:$0xff] %vm1645_vm12, %v1613_v44 }
 0x15d   : > { %v672_v18 = vpop.permute.xlu1 %671  ;;  %v658_v45 = vpop.permute.xlu0 %657 }
 0x15e   : > { %703 = vst.msk [vmem:[#allocation3 + $0x70] sm:$0xff] %vm688_vm5, %v672_v18  ;;  %696 = vst.msk [vmem:[#allocation3 + $0x38] sm:$0xff] %vm688_vm5, %v658_v45 }
 0x161   : > { %v797_v35 = vpop.permute.xlu1 %796  ;;  %v783_v20 = vpop.permute.xlu0 %782  ;;  %v1667_v22 = vld [vmem:[#allocation3 + $0x30] sm:$0xff]  ;;  %v1674_v63 = vld [vmem:[#allocation3 + $0x68] sm:$0xff] }
 0x162   : > { %828 = vst.msk [vmem:[#allocation3 + $0x70] sm:$0xff] %vm813_vm6, %v797_v35  ;;  %821 = vst.msk [vmem:[#allocation3 + $0x38] sm:$0xff] %vm813_vm6, %v783_v20  ;;  %2149 = vmatmul.mubr.msk.bf16.gmra.mrb[24].mxu0 %vm1703_vm13, %v1667_v22  ;;  %2177 = vmatmul.mubr.msk.bf16.gmra.mrb[20].mxu1 %vm1703_vm13, %v1674_v63 }
 0x163   : > { %2152 = vmatprep.mubr.msk.bf16.mxu0 %vm2278_vm3, %v2277_v8  ;;  %2180 = vmatprep.mubr.msk.bf16.mxu1 %vm2278_vm3, %v2277_v8 }
 0x165   : > { %v888_v46 = vpop.permute.xlu1 %887  ;;  %v874_v47 = vpop.permute.xlu0 %873 }
 0x166   : > { %919 = vst.msk [vmem:[#allocation3 + $0x70] sm:$0xff] %vm904_vm7, %v888_v46  ;;  %912 = vst.msk [vmem:[#allocation3 + $0x38] sm:$0xff] %vm904_vm7, %v874_v47 }
 0x169   : > { %v1089_v48 = vpop.permute.xlu1 %1088  ;;  %v1075_v49 = vpop.permute.xlu0 %1074 }
 0x16a   : > { %1120 = vst.msk [vmem:[#allocation3 + $0x70] sm:$0xff] %vm1105_vm8, %v1089_v48  ;;  %1113 = vst.msk [vmem:[#allocation3 + $0x38] sm:$0xff] %vm1105_vm8, %v1075_v49 }
 0x16d   : > { %v1213_v50 = vpop.permute.xlu1 %1212  ;;  %v1199_v51 = vpop.permute.xlu0 %1198 }
 0x16e   : > { %1244 = vst.msk [vmem:[#allocation3 + $0x70] sm:$0xff] %vm1229_vm9, %v1213_v50  ;;  %1237 = vst.msk [vmem:[#allocation3 + $0x38] sm:$0xff] %vm1229_vm9, %v1199_v51 }
 0x171   : > { %v1304_v8 = vpop.permute.xlu1 %1303  ;;  %v1290_v52 = vpop.permute.xlu0 %1289 }
 0x172   : > { %1335 = vst.msk [vmem:[#allocation3 + $0x70] sm:$0xff] %vm1320_vm10, %v1304_v8  ;;  %1328 = vst.msk [vmem:[#allocation3 + $0x38] sm:$0xff] %vm1320_vm10, %v1290_v52 }
 0x175   : > { %v1505_v2 = vpop.permute.xlu1 %1504  ;;  %v1491_v53 = vpop.permute.xlu0 %1490 }
 0x176   : > { %1536 = vst.msk [vmem:[#allocation3 + $0x70] sm:$0xff] %vm1521_vm11, %v1505_v2  ;;  %1529 = vst.msk [vmem:[#allocation3 + $0x38] sm:$0xff] %vm1521_vm11, %v1491_v53 }
 0x179   : > { %v1629_v57 = vpop.permute.xlu1 %1628  ;;  %v1615_v58 = vpop.permute.xlu0 %1614 }
 0x17a   : > { %1660 = vst.msk [vmem:[#allocation3 + $0x70] sm:$0xff] %vm1645_vm12, %v1629_v57  ;;  %1653 = vst.msk [vmem:[#allocation3 + $0x38] sm:$0xff] %vm1645_vm12, %v1615_v58 }
 0x181   : > { %v1787_v19 = vpop.f32.mrb[0].mxu0  ;;  %v1668_v7 = vld [vmem:[#allocation3 + $0x38] sm:$0xff]  ;;  %v1675_v59 = vld [vmem:[#allocation3 + $0x70] sm:$0xff] }
 0x182   : > { %v1788_v61 = vadd.f32 %v3025_v39, %v1787_v19  ;;  %v2126_v55 = vpop.f32.mrb[1].mxu0  ;;  %2153 = vmatmul.mubr.msk.bf16.gmra.mrb[28].mxu0 %vm1703_vm13, %v1668_v7  ;;  %2181 = vmatmul.mubr.msk.bf16.gmra.mrb[24].mxu1 %vm1703_vm13, %v1675_v59 }
 0x183   : > { %v1790_v56 = vpop.f32.mrb[2].mxu0 }
 0x184   : > { %1906 = vst [vmem:[%s3030_s28] sm:$0xff] %v1788_v61  ;;  %v1791_v1 = vadd.f32 %v3025_v39, %v1790_v56  ;;  %v2127_v3 = vpop.f32.mrb[3].mxu0 }
 0x186   : > { %1907 = vst [vmem:[%s3030_s28 + $0x8] sm:$0xff] %v1791_v1 }
 0x195   : > { %v1795_v4 = vpop.f32.mrb[4].mxu0  ;;  %v1851_v5 = vpop.f32.mrb[0].mxu1 }
 0x196   : > { %v1796_v6 = vadd.f32 %v3025_v39, %v1795_v4  ;;  %v1852_v10 = vadd.f32 %v3025_v39, %v1851_v5  ;;  %v2130_v12 = vpop.f32.mrb[5].mxu0  ;;  %v2158_v13 = vpop.f32.mrb[1].mxu1 }
 0x197   : > { %v1798_v14 = vpop.f32.mrb[6].mxu0  ;;  %v1854_v15 = vpop.f32.mrb[2].mxu1 }
 0x198   : > { %1908 = vst [vmem:[%s3030_s28 + $0x10] sm:$0xff] %v1796_v6  ;;  %1922 = vst [vmem:[%s3030_s28 + $0x80] sm:$0xff] %v1852_v10  ;;  %v1799_v16 = vadd.f32 %v3025_v39, %v1798_v14  ;;  %v1855_v17 = vadd.f32 %v3025_v39, %v1854_v15  ;;  %v2131_v23 = vpop.f32.mrb[7].mxu0  ;;  %v2159_v25 = vpop.f32.mrb[3].mxu1 }
 0x19a   : > { %1909 = vst [vmem:[%s3030_s28 + $0x18] sm:$0xff] %v1799_v16  ;;  %1923 = vst [vmem:[%s3030_s28 + $0x88] sm:$0xff] %v1855_v17 }
 0x1b5   : > { %v1803_v26 = vpop.f32.mrb[8].mxu0  ;;  %v1859_v27 = vpop.f32.mrb[4].mxu1 }
 0x1b6   : > { %v1804_v28 = vadd.f32 %v3025_v39, %v1803_v26  ;;  %v1860_v29 = vadd.f32 %v3025_v39, %v1859_v27  ;;  %v2134_v54 = vpop.f32.mrb[9].mxu0  ;;  %v2162_v9 = vpop.f32.mrb[5].mxu1 }
 0x1b7   : > { %v1806_v11 = vpop.f32.mrb[10].mxu0  ;;  %v1862_v31 = vpop.f32.mrb[6].mxu1 }
 0x1b8   : > { %1910 = vst [vmem:[%s3030_s28 + $0x20] sm:$0xff] %v1804_v28  ;;  %1924 = vst [vmem:[%s3030_s28 + $0x90] sm:$0xff] %v1860_v29  ;;  %v1807_v32 = vadd.f32 %v3025_v39, %v1806_v11  ;;  %v1863_v33 = vadd.f32 %v3025_v39, %v1862_v31  ;;  %v2135_v30 = vpop.f32.mrb[11].mxu0  ;;  %v2163_v21 = vpop.f32.mrb[7].mxu1 }
 0x1ba   : > { %1911 = vst [vmem:[%s3030_s28 + $0x28] sm:$0xff] %v1807_v32  ;;  %1925 = vst [vmem:[%s3030_s28 + $0x98] sm:$0xff] %v1863_v33 }
 0x1d5   : > { %v1811_v24 = vpop.f32.mrb[12].mxu0  ;;  %v1867_v43 = vpop.f32.mrb[8].mxu1 }
 0x1d6   : > { %v1812_v41 = vadd.f32 %v3025_v39, %v1811_v24  ;;  %v1868_v34 = vadd.f32 %v3025_v39, %v1867_v43  ;;  %v2138_v36 = vpop.f32.mrb[13].mxu0  ;;  %v2166_v37 = vpop.f32.mrb[9].mxu1 }
 0x1d7   : > { %v1814_v62 = vpop.f32.mrb[14].mxu0  ;;  %v1870_v0 = vpop.f32.mrb[10].mxu1 }
 0x1d8   : > { %1912 = vst [vmem:[%s3030_s28 + $0x30] sm:$0xff] %v1812_v41  ;;  %1926 = vst [vmem:[%s3030_s28 + $0xa0] sm:$0xff] %v1868_v34  ;;  %v1815_v60 = vadd.f32 %v3025_v39, %v1814_v62  ;;  %v1871_v38 = vadd.f32 %v3025_v39, %v1870_v0  ;;  %v2139_v40 = vpop.f32.mrb[15].mxu0  ;;  %v2167_v42 = vpop.f32.mrb[11].mxu1 }
 0x1da   : > { %1913 = vst [vmem:[%s3030_s28 + $0x38] sm:$0xff] %v1815_v60  ;;  %1927 = vst [vmem:[%s3030_s28 + $0xa8] sm:$0xff] %v1871_v38 }
 0x1f5   : > { %v1819_v44 = vpop.f32.mrb[16].mxu0  ;;  %v1875_v18 = vpop.f32.mrb[12].mxu1 }
 0x1f6   : > { %v1820_v45 = vadd.f32 %v3025_v39, %v1819_v44  ;;  %v1876_v35 = vadd.f32 %v3025_v39, %v1875_v18  ;;  %v2142_v20 = vpop.f32.mrb[17].mxu0  ;;  %v2170_v22 = vpop.f32.mrb[13].mxu1 }
 0x1f7   : > { %v1822_v63 = vpop.f32.mrb[18].mxu0  ;;  %v1878_v46 = vpop.f32.mrb[14].mxu1 }
 0x1f8   : > { %1914 = vst [vmem:[%s3030_s28 + $0x40] sm:$0xff] %v1820_v45  ;;  %1928 = vst [vmem:[%s3030_s28 + $0xb0] sm:$0xff] %v1876_v35  ;;  %v1823_v47 = vadd.f32 %v3025_v39, %v1822_v63  ;;  %v1879_v48 = vadd.f32 %v3025_v39, %v1878_v46  ;;  %v2143_v49 = vpop.f32.mrb[19].mxu0  ;;  %v2171_v50 = vpop.f32.mrb[15].mxu1 }
 0x1fa   : > { %1915 = vst [vmem:[%s3030_s28 + $0x48] sm:$0xff] %v1823_v47  ;;  %1929 = vst [vmem:[%s3030_s28 + $0xb8] sm:$0xff] %v1879_v48 }
 0x215   : > { %v1827_v51 = vpop.f32.mrb[20].mxu0  ;;  %v1883_v8 = vpop.f32.mrb[16].mxu1 }
 0x216   : > { %v1828_v52 = vadd.f32 %v3025_v39, %v1827_v51  ;;  %v1884_v2 = vadd.f32 %v3025_v39, %v1883_v8  ;;  %v2146_v53 = vpop.f32.mrb[21].mxu0  ;;  %v2174_v57 = vpop.f32.mrb[17].mxu1 }
 0x217   : > { %v1830_v58 = vpop.f32.mrb[22].mxu0  ;;  %v1886_v19 = vpop.f32.mrb[18].mxu1 }
 0x218   : > { %1916 = vst [vmem:[%s3030_s28 + $0x50] sm:$0xff] %v1828_v52  ;;  %1930 = vst [vmem:[%s3030_s28 + $0xc0] sm:$0xff] %v1884_v2  ;;  %v1831_v7 = vadd.f32 %v3025_v39, %v1830_v58  ;;  %v1887_v59 = vadd.f32 %v3025_v39, %v1886_v19  ;;  %v2147_v61 = vpop.f32.mrb[23].mxu0  ;;  %v2175_v55 = vpop.f32.mrb[19].mxu1 }
 0x21a   : > { %1917 = vst [vmem:[%s3030_s28 + $0x58] sm:$0xff] %v1831_v7  ;;  %1931 = vst [vmem:[%s3030_s28 + $0xc8] sm:$0xff] %v1887_v59 }
 0x235   : > { %v1835_v56 = vpop.f32.mrb[24].mxu0  ;;  %v1891_v1 = vpop.f32.mrb[20].mxu1 }
 0x236   : > { %v1836_v3 = vadd.f32 %v3025_v39, %v1835_v56  ;;  %v1892_v4 = vadd.f32 %v3025_v39, %v1891_v1  ;;  %v2150_v5 = vpop.f32.mrb[25].mxu0  ;;  %v2178_v6 = vpop.f32.mrb[21].mxu1 }
 0x237   : > { %v1838_v10 = vpop.f32.mrb[26].mxu0  ;;  %v1894_v12 = vpop.f32.mrb[22].mxu1 }
 0x238   : > { %1918 = vst [vmem:[%s3030_s28 + $0x60] sm:$0xff] %v1836_v3  ;;  %1932 = vst [vmem:[%s3030_s28 + $0xd0] sm:$0xff] %v1892_v4  ;;  %v1839_v13 = vadd.f32 %v3025_v39, %v1838_v10  ;;  %v1895_v14 = vadd.f32 %v3025_v39, %v1894_v12  ;;  %v2151_v15 = vpop.f32.mrb[27].mxu0  ;;  %v2179_v16 = vpop.f32.mrb[23].mxu1 }
 0x23a   : > { %1919 = vst [vmem:[%s3030_s28 + $0x68] sm:$0xff] %v1839_v13  ;;  %1933 = vst [vmem:[%s3030_s28 + $0xd8] sm:$0xff] %v1895_v14 }
 0x255   : > { %v1843_v17 = vpop.f32.mrb[28].mxu0  ;;  %v1899_v23 = vpop.f32.mrb[24].mxu1 }
 0x256   : > { %v1844_v25 = vadd.f32 %v3025_v39, %v1843_v17  ;;  %v1900_v26 = vadd.f32 %v3025_v39, %v1899_v23  ;;  %v2154_v27 = vpop.f32.mrb[29].mxu0  ;;  %v2182_v28 = vpop.f32.mrb[25].mxu1 }
 0x257   : > { %v1846_v29 = vpop.f32.mrb[30].mxu0  ;;  %v1902_v54 = vpop.f32.mrb[26].mxu1 }
 0x258   : > { %1920 = vst [vmem:[%s3030_s28 + $0x70] sm:$0xff] %v1844_v25  ;;  %1934 = vst [vmem:[%s3030_s28 + $0xe0] sm:$0xff] %v1900_v26  ;;  %v1847_v9 = vadd.f32 %v3025_v39, %v1846_v29  ;;  %v1903_v11 = vadd.f32 %v3025_v39, %v1902_v54  ;;  %v2155_v31 = vpop.f32.mrb[31].mxu0  ;;  %v2183_v32 = vpop.f32.mrb[27].mxu1 }
 0x25a   : > { %1921 = vst [vmem:[%s3030_s28 + $0x78] sm:$0xff] %v1847_v9  ;;  %1935 = vst [vmem:[%s3030_s28 + $0xe8] sm:$0xff] %v1903_v11 }
 0x25b PF: > { %s14_s17 = sadd.s32 1, %s2267_s17   ;;  %s3108_s15 = smov %s2263_s16 }
 0x25c   : > { %p11_p7 = scmp.ge.s32.totalorder %s14_s17, 5   ;;  %s3109_s16 = smov %s3111_s18 }
 0x25e   :  { %13 = sbr.rel (!%p11_p7) target bundleno = 2 (0x2), region = 75 }

</bundles_post_ra>
